<compile_context>
chip_gen: v5e
topology: v5e:2x2
jax: 0.10.0
libtpu: 0.0.40
codegen_flags: <defaults>
</compile_context>

<pallas_src>
import math
from functools import partial

import jax
import jax.numpy as jnp
from jax.experimental import pallas as pl
from jax.experimental.pallas import tpu as pltpu

NEG_INF = float(jnp.finfo(jnp.float32).min)


# ----------------------------- in-kernel helpers -----------------------------

def _layernorm(x, w, b, eps):
    mu = jnp.mean(x, axis=-1, keepdims=True)
    var = jnp.mean((x - mu) ** 2, axis=-1, keepdims=True)
    return (x - mu) * jax.lax.rsqrt(var + eps) * w + b


def _gelu_tanh(x):
    c = math.sqrt(2.0 / math.pi)
    return 0.5 * x * (1.0 + jnp.tanh(c * (x + 0.044715 * x * x * x)))


# ------------------------------ fused kernel ---------------------------------

def fused_encoder_kernel(x_ref, pos_ref, mask_ref,
                         ln1_w_ref, ln1_b_ref,
                         wqk_ref, bqk_ref, wv_ref, bv_ref, wo_ref, bo_ref,
                         ln2_w_ref, ln2_b_ref,
                         w1_ref, b1_ref, w2_ref, b2_ref,
                         lnf_w_ref, lnf_b_ref,
                         out_ref, x_acc,
                         *, n_head, eps, matmul_dtype):
    """One (batch, layer) grid step of the fused pre-LN DETR encoder."""
    layer = pl.program_id(1)
    n_layers = pl.num_programs(1)

    # Load the residual stream into VMEM scratch at the first layer only.
    @pl.when(layer == 0)
    def _():
        x_acc[...] = x_ref[0]

    x = x_acc[...]                       # (S, C) float32, VMEM-resident
    pos = pos_ref[0]                     # (S, C)
    S, C = x.shape
    d = C // n_head
    scale = 1.0 / math.sqrt(d)

    # Hoisted key-padding bias: (1, S), 0 where attend, finfo.min where masked.
    key_bias = jnp.where(mask_ref[0] > 0.5, NEG_INF, 0.0)

    # ---- self-attention (pre-LN) ----
    x_attn = _layernorm(x, ln1_w_ref[0], ln1_b_ref[0], eps)
    qk_in = (x_attn + pos).astype(matmul_dtype)

    # Fused Q/K projection (one (C, 2C) matmul), separate V projection.
    qk = jnp.dot(qk_in, wqk_ref[0],
                 preferred_element_type=jnp.float32) + bqk_ref[0]        # (S, 2C)
    v = jnp.dot(x_attn.astype(matmul_dtype), wv_ref[0],
                preferred_element_type=jnp.float32) + bv_ref[0]          # (S, C)

    q = qk[:, :C].astype(matmul_dtype)
    k = qk[:, C:].astype(matmul_dtype)
    v = v.astype(matmul_dtype)

    # Split heads: (S, C) -> (H, S, d) via lane slices + stack (no tiny matmuls).
    q3 = jnp.stack([q[:, h * d:(h + 1) * d] for h in range(n_head)], axis=0)
    k3 = jnp.stack([k[:, h * d:(h + 1) * d] for h in range(n_head)], axis=0)
    v3 = jnp.stack([v[:, h * d:(h + 1) * d] for h in range(n_head)], axis=0)

    # Batched attention over all heads at once.
    att = jnp.einsum("hqd,hkd->hqk", q3, k3,
                     preferred_element_type=jnp.float32) * scale         # (H, S, S)
    att = att + key_bias[None]                                           # mask bias
    att = att - jnp.max(att, axis=-1, keepdims=True)
    p = jnp.exp(att)
    p = p / jnp.sum(p, axis=-1, keepdims=True)

    ctx = jnp.einsum("hqk,hkd->hqd", p.astype(matmul_dtype), v3,
                     preferred_element_type=jnp.float32)                 # (H, S, d)
    y = jnp.concatenate([ctx[h] for h in range(n_head)], axis=-1)        # (S, C)
    y = jnp.dot(y.astype(matmul_dtype), wo_ref[0],
                preferred_element_type=jnp.float32) + bo_ref[0]

    x = x + y                                                            # residual 1

    # ---- FFN (pre-LN) ----
    x_ffn = _layernorm(x, ln2_w_ref[0], ln2_b_ref[0], eps)
    h1 = jnp.dot(x_ffn.astype(matmul_dtype), w1_ref[0],
                 preferred_element_type=jnp.float32) + b1_ref[0]
    h1 = _gelu_tanh(h1)
    h2 = jnp.dot(h1.astype(matmul_dtype), w2_ref[0],
                 preferred_element_type=jnp.float32) + b2_ref[0]

    x = x + h2                                                           # residual 2
    x_acc[...] = x

    # Final LayerNorm + single HBM writeback only after the last layer.
    @pl.when(layer == n_layers - 1)
    def _():
        out_ref[0] = _layernorm(x, lnf_w_ref[0], lnf_b_ref[0], eps)


# ------------------------------ param plumbing --------------------------------

def stack_layer_params(layer_params, matmul_dtype):
    """Stack per-layer params with a leading layer axis; fuse Q/K; cast weights."""
    def stk(name):
        return jnp.stack([p[name] for p in layer_params], axis=0)

    return {
        "ln1_w": stk("ln1_w"), "ln1_b": stk("ln1_b"),
        "wqk": jnp.concatenate([stk("wq"), stk("wk")], axis=-1).astype(matmul_dtype),
        "bqk": jnp.concatenate([stk("bq"), stk("bk")], axis=-1),
        "wv": stk("wv").astype(matmul_dtype), "bv": stk("bv"),
        "wo": stk("wo").astype(matmul_dtype), "bo": stk("bo"),
        "ln2_w": stk("ln2_w"), "ln2_b": stk("ln2_b"),
        "w1": stk("w1").astype(matmul_dtype), "b1": stk("b1"),
        "w2": stk("w2").astype(matmul_dtype), "b2": stk("b2"),
    }


def encoder_forward(x, pos, mask, layer_params, final_norm, *, n_head, eps,
                    matmul_dtype=jnp.bfloat16):
    B, S, C = x.shape
    L = len(layer_params)
    w = stack_layer_params(layer_params, matmul_dtype)
    F = w["w1"].shape[-1]

    # Activations indexed by batch (constant along the layer axis -> DMA'd once
    # per batch element); weights indexed by the layer grid axis; final-norm
    # params are fixed.
    act = lambda s: pl.BlockSpec((1,) + s, lambda b, l: (b, 0, 0))
    lyr = lambda s: pl.BlockSpec((1,) + s, lambda b, l: (l, 0, 0))
    fix = lambda s: pl.BlockSpec(s, lambda b, l: (0,) * len(s))

    in_specs = [
        act((S, C)), act((S, C)), act((1, S)),
        lyr((1, C)), lyr((1, C)),                  # norm1
        lyr((C, 2 * C)), lyr((1, 2 * C)),          # fused q/k proj
        lyr((C, C)), lyr((1, C)),                  # v proj
        lyr((C, C)), lyr((1, C)),                  # out proj
        lyr((1, C)), lyr((1, C)),                  # norm2
        lyr((C, F)), lyr((1, F)),                  # ffn lin1
        lyr((F, C)), lyr((1, C)),                  # ffn lin2
        fix((1, C)), fix((1, C)),                  # final norm
    ]

    kernel = partial(fused_encoder_kernel, n_head=n_head, eps=eps,
                     matmul_dtype=matmul_dtype)

    return pl.pallas_call(
        kernel,
        out_shape=jax.ShapeDtypeStruct((B, S, C), jnp.float32),
        grid=(B, L),
        in_specs=in_specs,
        out_specs=pl.BlockSpec((1, S, C), lambda b, l: (b, 0, 0)),
        scratch_shapes=[pltpu.VMEM((S, C), jnp.float32)],
        compiler_params=pltpu.CompilerParams(
            dimension_semantics=("parallel", "arbitrary"),
            vmem_limit_bytes=32 * 1024 * 1024,
        ),
    )(x, pos, mask,
      w["ln1_w"], w["ln1_b"], w["wqk"], w["bqk"], w["wv"], w["bv"],
      w["wo"], w["bo"], w["ln2_w"], w["ln2_b"],
      w["w1"], w["b1"], w["w2"], w["b2"],
      final_norm["w"], final_norm["b"])


# ---------------------------- parameter init ----------------------------------

def init_params(key, num_layers, C, F, std=0.02):
    layers = []
    for _ in range(num_layers):
        keys = jax.random.split(key, 7)
        key = keys[0]
        p = {
            "ln1_w": jnp.ones((1, C), jnp.float32),
            "ln1_b": jnp.zeros((1, C), jnp.float32),
            "wq": std * jax.random.normal(keys[1], (C, C), jnp.float32),
            "bq": jnp.zeros((1, C), jnp.float32),
            "wk": std * jax.random.normal(keys[2], (C, C), jnp.float32),
            "bk": jnp.zeros((1, C), jnp.float32),
            "wv": std * jax.random.normal(keys[3], (C, C), jnp.float32),
            "bv": jnp.zeros((1, C), jnp.float32),
            "wo": std * jax.random.normal(keys[4], (C, C), jnp.float32),
            "bo": jnp.zeros((1, C), jnp.float32),
            "ln2_w": jnp.ones((1, C), jnp.float32),
            "ln2_b": jnp.zeros((1, C), jnp.float32),
            "w1": std * jax.random.normal(keys[5], (C, F), jnp.float32),
            "b1": jnp.zeros((1, F), jnp.float32),
            "w2": std * jax.random.normal(keys[6], (F, C), jnp.float32),
            "b2": jnp.zeros((1, C), jnp.float32),
        }
        layers.append(p)
    final = {"w": jnp.ones((1, C), jnp.float32), "b": jnp.zeros((1, C), jnp.float32)}
    return layers, final, key


# ------------------------------ reference (JAX) --------------------------------

def encoder_reference(x, pos, mask, layer_params, final_norm, *, n_head, eps):
    hi = jax.lax.Precision.HIGHEST
    B, S, C = x.shape
    head = C // n_head
    for p in layer_params:
        xa = _layernorm(x, p["ln1_w"][0], p["ln1_b"][0], eps)
        qk = xa + pos
        q = jnp.einsum("bsc,cd->bsd", qk, p["wq"], precision=hi) + p["bq"][0]
        k = jnp.einsum("bsc,cd->bsd", qk, p["wk"], precision=hi) + p["bk"][0]
        v = jnp.einsum("bsc,cd->bsd", xa, p["wv"], precision=hi) + p["bv"][0]
        q = q.reshape(B, S, n_head, head).transpose(0, 2, 1, 3)
        k = k.reshape(B, S, n_head, head).transpose(0, 2, 1, 3)
        v = v.reshape(B, S, n_head, head).transpose(0, 2, 1, 3)
        att = jnp.einsum("bhld,bhsd->bhls", q, k, precision=hi) / math.sqrt(head)
        att = jnp.where(mask[:, None, :, :] > 0.5, NEG_INF, att)
        att = jax.nn.softmax(att, axis=-1)
        y = jnp.einsum("bhls,bhsd->bhld", att, v, precision=hi)
        y = y.transpose(0, 2, 1, 3).reshape(B, S, C)
        y = jnp.einsum("bsc,cd->bsd", y, p["wo"], precision=hi) + p["bo"][0]
        x = x + y
        xf = _layernorm(x, p["ln2_w"][0], p["ln2_b"][0], eps)
        h1 = _gelu_tanh(jnp.einsum("bsc,cf->bsf", xf, p["w1"], precision=hi) + p["b1"][0])
        h2 = jnp.einsum("bsf,fc->bsc", h1, p["w2"], precision=hi) + p["b2"][0]
        x = x + h2
    return _layernorm(x, final_norm["w"][0], final_norm["b"][0], eps)


# ---------------------------------- main ---------------------------------------

if __name__ == "__main__":
    # small DETR-ish config
    B, S = 2, 16
    C = 32            # hidden_size
    n_head = 4        # num_attention_heads
    F = C * 2         # hidden_size * ffn_scale_factor
    num_layers = 2    # num_encoder_layers
    eps = 1e-5

    key = jax.random.PRNGKey(0)
    layer_params, final_norm, key = init_params(key, num_layers, C, F)

    k1, k2 = jax.random.split(key)
    x = jax.random.normal(k1, (B, S, C), jnp.float32)
    pos = jax.random.normal(k2, (B, S, C), jnp.float32)

    # key_padding_mask: last 4 positions of batch element 1 are padding
    mask = jnp.zeros((B, 1, S), jnp.float32)
    mask = mask.at[1, 0, S - 4:].set(1.0)

    out = encoder_forward(x, pos, mask, layer_params, final_norm,
                          n_head=n_head, eps=eps)
    out = jax.block_until_ready(out)

    ref = encoder_reference(x, pos, mask, layer_params, final_norm,
                            n_head=n_head, eps=eps)
    assert out.shape == (B, S, C)
    assert bool(jnp.all(jnp.isfinite(out)))
    assert bool(jnp.allclose(out, ref, atol=2e-2, rtol=2e-2))

    print("KERNEL_OK")
</pallas_src>

<mosaic_0001>
module attributes {stable_mosaic.version = 11 : i64} {
  func.func @fused_encoder_kernel(%arg0: i32, %arg1: i32, %arg2: memref<1x16x32xf32, #tpu.memory_space<vmem>>, %arg3: memref<1x16x32xf32, #tpu.memory_space<vmem>>, %arg4: memref<1x1x16xf32, #tpu.memory_space<vmem>>, %arg5: memref<1x1x32xf32, #tpu.memory_space<vmem>>, %arg6: memref<1x1x32xf32, #tpu.memory_space<vmem>>, %arg7: memref<1x32x64xbf16, #tpu.memory_space<vmem>>, %arg8: memref<1x1x64xf32, #tpu.memory_space<vmem>>, %arg9: memref<1x32x32xbf16, #tpu.memory_space<vmem>>, %arg10: memref<1x1x32xf32, #tpu.memory_space<vmem>>, %arg11: memref<1x32x32xbf16, #tpu.memory_space<vmem>>, %arg12: memref<1x1x32xf32, #tpu.memory_space<vmem>>, %arg13: memref<1x1x32xf32, #tpu.memory_space<vmem>>, %arg14: memref<1x1x32xf32, #tpu.memory_space<vmem>>, %arg15: memref<1x32x64xbf16, #tpu.memory_space<vmem>>, %arg16: memref<1x1x64xf32, #tpu.memory_space<vmem>>, %arg17: memref<1x64x32xbf16, #tpu.memory_space<vmem>>, %arg18: memref<1x1x32xf32, #tpu.memory_space<vmem>>, %arg19: memref<1x32xf32, #tpu.memory_space<vmem>>, %arg20: memref<1x32xf32, #tpu.memory_space<vmem>>, %arg21: memref<1x16x32xf32, #tpu.memory_space<vmem>>, %arg22: memref<16x32xf32, #tpu.memory_space<vmem>>) attributes {dimension_semantics = [#tpu.dimension_semantics<parallel>, #tpu.dimension_semantics<arbitrary>], iteration_bounds = array<i64: 2, 2>, scalar_prefetch = 0 : i64, scratch_operands = 1 : i64, tpu.core_type = #tpu.core_type<tc>, window_params = [{transform_indices = @transform_0, window_bounds = array<i64: 1, 16, 32>}, {transform_indices = @transform_1, window_bounds = array<i64: 1, 16, 32>}, {transform_indices = @transform_2, window_bounds = array<i64: 1, 1, 16>}, {transform_indices = @transform_3, window_bounds = array<i64: 1, 1, 32>}, {transform_indices = @transform_4, window_bounds = array<i64: 1, 1, 32>}, {transform_indices = @transform_5, window_bounds = array<i64: 1, 32, 64>}, {transform_indices = @transform_6, window_bounds = array<i64: 1, 1, 64>}, {transform_indices = @transform_7, window_bounds = array<i64: 1, 32, 32>}, {transform_indices = @transform_8, window_bounds = array<i64: 1, 1, 32>}, {transform_indices = @transform_9, window_bounds = array<i64: 1, 32, 32>}, {transform_indices = @transform_10, window_bounds = array<i64: 1, 1, 32>}, {transform_indices = @transform_11, window_bounds = array<i64: 1, 1, 32>}, {transform_indices = @transform_12, window_bounds = array<i64: 1, 1, 32>}, {transform_indices = @transform_13, window_bounds = array<i64: 1, 32, 64>}, {transform_indices = @transform_14, window_bounds = array<i64: 1, 1, 64>}, {transform_indices = @transform_15, window_bounds = array<i64: 1, 64, 32>}, {transform_indices = @transform_16, window_bounds = array<i64: 1, 1, 32>}, {pipeline_mode = #tpu.pipeline_mode<synchronous>, transform_indices = @transform_17, window_bounds = array<i64: 1, 32>}, {pipeline_mode = #tpu.pipeline_mode<synchronous>, transform_indices = @transform_18, window_bounds = array<i64: 1, 32>}, {transform_indices = @transform_19, window_bounds = array<i64: 1, 16, 32>}]} {
    %c0_i32 = arith.constant 0 : i32
    %0 = arith.cmpi eq, %arg1, %c0_i32 : i32
    %1 = arith.extui %0 : i1 to i32
    %c0_i32_0 = arith.constant 0 : i32
    %2 = arith.cmpi ne, %1, %c0_i32_0 : i32
    scf.if %2 {
      %c0_79 = arith.constant 0 : index
      %c0_80 = arith.constant 0 : index
      %c0_81 = arith.constant 0 : index
      %183 = vector.load %arg2[%c0_79, %c0_80, %c0_81] : memref<1x16x32xf32, #tpu.memory_space<vmem>>, vector<1x16x32xf32>
      %184 = vector.shape_cast %183 : vector<1x16x32xf32> to vector<16x32xf32>
      %c0_82 = arith.constant 0 : index
      %c0_83 = arith.constant 0 : index
      %185 = vector.load %arg22[%c0_82, %c0_83] : memref<16x32xf32, #tpu.memory_space<vmem>>, vector<16x32xf32>
      tpu.vector_store %arg22[%c0_82, %c0_83], %184 {strides = array<i32>} : memref<16x32xf32, #tpu.memory_space<vmem>>, vector<16x32xf32>,
    } else {
    }
    %c0 = arith.constant 0 : index
    %c0_1 = arith.constant 0 : index
    %3 = vector.load %arg22[%c0, %c0_1] : memref<16x32xf32, #tpu.memory_space<vmem>>, vector<16x32xf32>
    %c0_2 = arith.constant 0 : index
    %c0_3 = arith.constant 0 : index
    %c0_4 = arith.constant 0 : index
    %4 = vector.load %arg3[%c0_2, %c0_3, %c0_4] : memref<1x16x32xf32, #tpu.memory_space<vmem>>, vector<1x16x32xf32>
    %5 = vector.shape_cast %4 : vector<1x16x32xf32> to vector<16x32xf32>
    %c0_5 = arith.constant 0 : index
    %c0_6 = arith.constant 0 : index
    %c0_7 = arith.constant 0 : index
    %6 = vector.load %arg4[%c0_5, %c0_6, %c0_7] : memref<1x1x16xf32, #tpu.memory_space<vmem>>, vector<1x1x16xf32>
    %7 = vector.shape_cast %6 : vector<1x1x16xf32> to vector<1x16xf32>
    %cst = arith.constant 5.000000e-01 : f32
    %8 = vector.broadcast %cst : f32 to vector<1x16xf32>
    %9 = arith.cmpf ogt, %7, %8 : vector<1x16xf32>
    %cst_8 = arith.constant -3.40282347E+38 : f32
    %cst_9 = arith.constant 0.000000e+00 : f32
    %10 = vector.broadcast %cst_8 : f32 to vector<1x16xf32>
    %11 = vector.broadcast %cst_9 : f32 to vector<1x16xf32>
    %12 = arith.select %9, %10, %11 : vector<1x16xi1>, vector<1x16xf32>
    %c0_10 = arith.constant 0 : index
    %c0_11 = arith.constant 0 : index
    %c0_12 = arith.constant 0 : index
    %13 = vector.load %arg5[%c0_10, %c0_11, %c0_12] : memref<1x1x32xf32, #tpu.memory_space<vmem>>, vector<1x1x32xf32>
    %14 = vector.shape_cast %13 : vector<1x1x32xf32> to vector<1x32xf32>
    %c0_13 = arith.constant 0 : index
    %c0_14 = arith.constant 0 : index
    %c0_15 = arith.constant 0 : index
    %15 = vector.load %arg6[%c0_13, %c0_14, %c0_15] : memref<1x1x32xf32, #tpu.memory_space<vmem>>, vector<1x1x32xf32>
    %16 = vector.shape_cast %15 : vector<1x1x32xf32> to vector<1x32xf32>
    %cst_16 = arith.constant dense<0.000000e+00> : vector<16xf32>
    %17 = vector.multi_reduction <add>, %3, %cst_16 [1] : vector<16x32xf32> to vector<16xf32>
    %18 = vector.shape_cast %17 : vector<16xf32> to vector<16x1xf32>
    %cst_17 = arith.constant 3.200000e+01 : f32
    %19 = vector.broadcast %cst_17 : f32 to vector<16x1xf32>
    %20 = arith.divf %18, %19 : vector<16x1xf32>
    %21 = vector.broadcast %20 : vector<16x1xf32> to vector<16x32xf32>
    %22 = arith.subf %3, %21 : vector<16x32xf32>
    %23 = arith.mulf %22, %22 : vector<16x32xf32>
    %cst_18 = arith.constant dense<0.000000e+00> : vector<16xf32>
    %24 = vector.multi_reduction <add>, %23, %cst_18 [1] : vector<16x32xf32> to vector<16xf32>
    %25 = vector.shape_cast %24 : vector<16xf32> to vector<16x1xf32>
    %cst_19 = arith.constant 3.200000e+01 : f32
    %26 = vector.broadcast %cst_19 : f32 to vector<16x1xf32>
    %27 = arith.divf %25, %26 : vector<16x1xf32>
    %28 = vector.broadcast %20 : vector<16x1xf32> to vector<16x32xf32>
    %29 = arith.subf %3, %28 : vector<16x32xf32>
    %cst_20 = arith.constant 9.99999974E-6 : f32
    %30 = vector.broadcast %cst_20 : f32 to vector<16x1xf32>
    %31 = arith.addf %27, %30 : vector<16x1xf32>
    %32 = math.rsqrt %31 : vector<16x1xf32>
    %33 = vector.broadcast %32 : vector<16x1xf32> to vector<16x32xf32>
    %34 = arith.mulf %29, %33 : vector<16x32xf32>
    %35 = vector.broadcast %14 : vector<1x32xf32> to vector<16x32xf32>
    %36 = arith.mulf %34, %35 : vector<16x32xf32>
    %37 = vector.broadcast %16 : vector<1x32xf32> to vector<16x32xf32>
    %38 = arith.addf %36, %37 : vector<16x32xf32>
    %39 = arith.addf %38, %5 : vector<16x32xf32>
    %40 = arith.truncf %39 : vector<16x32xf32> to vector<16x32xbf16>
    %c0_21 = arith.constant 0 : index
    %c0_22 = arith.constant 0 : index
    %c0_23 = arith.constant 0 : index
    %41 = vector.load %arg7[%c0_21, %c0_22, %c0_23] : memref<1x32x64xbf16, #tpu.memory_space<vmem>>, vector<1x32x64xbf16>
    %42 = vector.shape_cast %41 : vector<1x32x64xbf16> to vector<32x64xbf16>
    %cst_24 = arith.constant dense<0.000000e+00> : vector<16x64xf32>
    %43 = tpu.matmul %40, %42, %cst_24 {dimension_numbers = #tpu.dot_dimension_numbers<[1], [0], [0], [1], [0, 0, 1, 1], [], []>} : vector<16x32xbf16>, vector<32x64xbf16>, vector<16x64xf32> -> vector<16x64xf32>
    %c0_25 = arith.constant 0 : index
    %c0_26 = arith.constant 0 : index
    %c0_27 = arith.constant 0 : index
    %44 = vector.load %arg8[%c0_25, %c0_26, %c0_27] : memref<1x1x64xf32, #tpu.memory_space<vmem>>, vector<1x1x64xf32>
    %45 = vector.shape_cast %44 : vector<1x1x64xf32> to vector<1x64xf32>
    %46 = vector.broadcast %45 : vector<1x64xf32> to vector<16x64xf32>
    %47 = arith.addf %43, %46 : vector<16x64xf32>
    %48 = arith.truncf %38 : vector<16x32xf32> to vector<16x32xbf16>
    %c0_28 = arith.constant 0 : index
    %c0_29 = arith.constant 0 : index
    %c0_30 = arith.constant 0 : index
    %49 = vector.load %arg9[%c0_28, %c0_29, %c0_30] : memref<1x32x32xbf16, #tpu.memory_space<vmem>>, vector<1x32x32xbf16>
    %50 = vector.shape_cast %49 : vector<1x32x32xbf16> to vector<32x32xbf16>
    %cst_31 = arith.constant dense<0.000000e+00> : vector<16x32xf32>
    %51 = tpu.matmul %48, %50, %cst_31 {dimension_numbers = #tpu.dot_dimension_numbers<[1], [0], [0], [1], [0, 0, 1, 1], [], []>} : vector<16x32xbf16>, vector<32x32xbf16>, vector<16x32xf32> -> vector<16x32xf32>
    %c0_32 = arith.constant 0 : index
    %c0_33 = arith.constant 0 : index
    %c0_34 = arith.constant 0 : index
    %52 = vector.load %arg10[%c0_32, %c0_33, %c0_34] : memref<1x1x32xf32, #tpu.memory_space<vmem>>, vector<1x1x32xf32>
    %53 = vector.shape_cast %52 : vector<1x1x32xf32> to vector<1x32xf32>
    %54 = vector.broadcast %53 : vector<1x32xf32> to vector<16x32xf32>
    %55 = arith.addf %51, %54 : vector<16x32xf32>
    %56 = vector.extract_strided_slice %47 {offsets = [0, 0], sizes = [16, 32], strides = [1, 1]} : vector<16x64xf32> to vector<16x32xf32>
    %57 = arith.truncf %56 : vector<16x32xf32> to vector<16x32xbf16>
    %58 = vector.extract_strided_slice %47 {offsets = [0, 32], sizes = [16, 32], strides = [1, 1]} : vector<16x64xf32> to vector<16x32xf32>
    %59 = arith.truncf %58 : vector<16x32xf32> to vector<16x32xbf16>
    %60 = arith.truncf %55 : vector<16x32xf32> to vector<16x32xbf16>
    %61 = vector.extract_strided_slice %57 {offsets = [0, 0], sizes = [16, 8], strides = [1, 1]} : vector<16x32xbf16> to vector<16x8xbf16>
    %62 = vector.extract_strided_slice %57 {offsets = [0, 8], sizes = [16, 8], strides = [1, 1]} : vector<16x32xbf16> to vector<16x8xbf16>
    %63 = vector.extract_strided_slice %57 {offsets = [0, 16], sizes = [16, 8], strides = [1, 1]} : vector<16x32xbf16> to vector<16x8xbf16>
    %64 = vector.extract_strided_slice %57 {offsets = [0, 24], sizes = [16, 8], strides = [1, 1]} : vector<16x32xbf16> to vector<16x8xbf16>
    %65 = vector.shape_cast %61 : vector<16x8xbf16> to vector<1x16x8xbf16>
    %66 = vector.shape_cast %62 : vector<16x8xbf16> to vector<1x16x8xbf16>
    %67 = vector.shape_cast %63 : vector<16x8xbf16> to vector<1x16x8xbf16>
    %68 = vector.shape_cast %64 : vector<16x8xbf16> to vector<1x16x8xbf16>
    %69 = tpu.concatenate %65, %66, %67, %68 in 0 : vector<1x16x8xbf16>, vector<1x16x8xbf16>, vector<1x16x8xbf16>, vector<1x16x8xbf16> -> vector<4x16x8xbf16>
    %70 = vector.extract_strided_slice %59 {offsets = [0, 0], sizes = [16, 8], strides = [1, 1]} : vector<16x32xbf16> to vector<16x8xbf16>
    %71 = vector.extract_strided_slice %59 {offsets = [0, 8], sizes = [16, 8], strides = [1, 1]} : vector<16x32xbf16> to vector<16x8xbf16>
    %72 = vector.extract_strided_slice %59 {offsets = [0, 16], sizes = [16, 8], strides = [1, 1]} : vector<16x32xbf16> to vector<16x8xbf16>
    %73 = vector.extract_strided_slice %59 {offsets = [0, 24], sizes = [16, 8], strides = [1, 1]} : vector<16x32xbf16> to vector<16x8xbf16>
    %74 = vector.shape_cast %70 : vector<16x8xbf16> to vector<1x16x8xbf16>
    %75 = vector.shape_cast %71 : vector<16x8xbf16> to vector<1x16x8xbf16>
    %76 = vector.shape_cast %72 : vector<16x8xbf16> to vector<1x16x8xbf16>
    %77 = vector.shape_cast %73 : vector<16x8xbf16> to vector<1x16x8xbf16>
    %78 = tpu.concatenate %74, %75, %76, %77 in 0 : vector<1x16x8xbf16>, vector<1x16x8xbf16>, vector<1x16x8xbf16>, vector<1x16x8xbf16> -> vector<4x16x8xbf16>
    %79 = vector.extract_strided_slice %60 {offsets = [0, 0], sizes = [16, 8], strides = [1, 1]} : vector<16x32xbf16> to vector<16x8xbf16>
    %80 = vector.extract_strided_slice %60 {offsets = [0, 8], sizes = [16, 8], strides = [1, 1]} : vector<16x32xbf16> to vector<16x8xbf16>
    %81 = vector.extract_strided_slice %60 {offsets = [0, 16], sizes = [16, 8], strides = [1, 1]} : vector<16x32xbf16> to vector<16x8xbf16>
    %82 = vector.extract_strided_slice %60 {offsets = [0, 24], sizes = [16, 8], strides = [1, 1]} : vector<16x32xbf16> to vector<16x8xbf16>
    %83 = vector.shape_cast %79 : vector<16x8xbf16> to vector<1x16x8xbf16>
    %84 = vector.shape_cast %80 : vector<16x8xbf16> to vector<1x16x8xbf16>
    %85 = vector.shape_cast %81 : vector<16x8xbf16> to vector<1x16x8xbf16>
    %86 = vector.shape_cast %82 : vector<16x8xbf16> to vector<1x16x8xbf16>
    %87 = tpu.concatenate %83, %84, %85, %86 in 0 : vector<1x16x8xbf16>, vector<1x16x8xbf16>, vector<1x16x8xbf16>, vector<1x16x8xbf16> -> vector<4x16x8xbf16>
    "tpu.trace_start"() <{level = 10 : i32, message = "hqd,hkd->hqk"}> : () -> ()
    %cst_35 = arith.constant dense<0.000000e+00> : vector<4x16x16xf32>
    %88 = tpu.matmul %69, %78, %cst_35 {dimension_numbers = #tpu.dot_dimension_numbers<[2], [2], [1], [1], [0, 0, 0, 1, 1, 1], [0], [0]>} : vector<4x16x8xbf16>, vector<4x16x8xbf16>, vector<4x16x16xf32> -> vector<4x16x16xf32>
    "tpu.trace_stop"() : () -> ()
    %cst_36 = arith.constant 0.353553385 : f32
    %89 = vector.broadcast %cst_36 : f32 to vector<4x16x16xf32>
    %90 = arith.mulf %88, %89 : vector<4x16x16xf32>
    %91 = vector.shape_cast %12 : vector<1x16xf32> to vector<1x1x16xf32>
    %92 = vector.broadcast %91 : vector<1x1x16xf32> to vector<4x16x16xf32>
    %93 = arith.addf %90, %92 : vector<4x16x16xf32>
    %cst_37 = arith.constant dense<0xFF800000> : vector<4x16xf32>
    %94 = vector.multi_reduction <maximumf>, %93, %cst_37 [2] : vector<4x16x16xf32> to vector<4x16xf32>
    %95 = vector.shape_cast %94 : vector<4x16xf32> to vector<4x16x1xf32>
    %96 = vector.broadcast %95 : vector<4x16x1xf32> to vector<4x16x16xf32>
    %97 = arith.subf %93, %96 : vector<4x16x16xf32>
    %98 = math.exp %97 : vector<4x16x16xf32>
    %cst_38 = arith.constant dense<0.000000e+00> : vector<4x16xf32>
    %99 = vector.multi_reduction <add>, %98, %cst_38 [2] : vector<4x16x16xf32> to vector<4x16xf32>
    %100 = vector.shape_cast %99 : vector<4x16xf32> to vector<4x16x1xf32>
    %101 = vector.broadcast %100 : vector<4x16x1xf32> to vector<4x16x16xf32>
    %102 = arith.divf %98, %101 : vector<4x16x16xf32>
    %103 = arith.truncf %102 : vector<4x16x16xf32> to vector<4x16x16xbf16>
    "tpu.trace_start"() <{level = 10 : i32, message = "hqk,hkd->hqd"}> : () -> ()
    %cst_39 = arith.constant dense<0.000000e+00> : vector<4x16x8xf32>
    %104 = tpu.matmul %103, %87, %cst_39 {dimension_numbers = #tpu.dot_dimension_numbers<[2], [1], [1], [2], [0, 0, 0, 1, 1, 2], [0], [0]>} : vector<4x16x16xbf16>, vector<4x16x8xbf16>, vector<4x16x8xf32> -> vector<4x16x8xf32>
    "tpu.trace_stop"() : () -> ()
    %105 = vector.extract_strided_slice %104 {offsets = [0, 0, 0], sizes = [1, 16, 8], strides = [1, 1, 1]} : vector<4x16x8xf32> to vector<1x16x8xf32>
    %106 = vector.shape_cast %105 : vector<1x16x8xf32> to vector<16x8xf32>
    %107 = vector.extract_strided_slice %104 {offsets = [1, 0, 0], sizes = [1, 16, 8], strides = [1, 1, 1]} : vector<4x16x8xf32> to vector<1x16x8xf32>
    %108 = vector.shape_cast %107 : vector<1x16x8xf32> to vector<16x8xf32>
    %109 = vector.extract_strided_slice %104 {offsets = [2, 0, 0], sizes = [1, 16, 8], strides = [1, 1, 1]} : vector<4x16x8xf32> to vector<1x16x8xf32>
    %110 = vector.shape_cast %109 : vector<1x16x8xf32> to vector<16x8xf32>
    %111 = vector.extract_strided_slice %104 {offsets = [3, 0, 0], sizes = [1, 16, 8], strides = [1, 1, 1]} : vector<4x16x8xf32> to vector<1x16x8xf32>
    %112 = vector.shape_cast %111 : vector<1x16x8xf32> to vector<16x8xf32>
    %113 = tpu.concatenate %106, %108, %110, %112 in 1 : vector<16x8xf32>, vector<16x8xf32>, vector<16x8xf32>, vector<16x8xf32> -> vector<16x32xf32>
    %114 = arith.truncf %113 : vector<16x32xf32> to vector<16x32xbf16>
    %c0_40 = arith.constant 0 : index
    %c0_41 = arith.constant 0 : index
    %c0_42 = arith.constant 0 : index
    %115 = vector.load %arg11[%c0_40, %c0_41, %c0_42] : memref<1x32x32xbf16, #tpu.memory_space<vmem>>, vector<1x32x32xbf16>
    %116 = vector.shape_cast %115 : vector<1x32x32xbf16> to vector<32x32xbf16>
    %cst_43 = arith.constant dense<0.000000e+00> : vector<16x32xf32>
    %117 = tpu.matmul %114, %116, %cst_43 {dimension_numbers = #tpu.dot_dimension_numbers<[1], [0], [0], [1], [0, 0, 1, 1], [], []>} : vector<16x32xbf16>, vector<32x32xbf16>, vector<16x32xf32> -> vector<16x32xf32>
    %c0_44 = arith.constant 0 : index
    %c0_45 = arith.constant 0 : index
    %c0_46 = arith.constant 0 : index
    %118 = vector.load %arg12[%c0_44, %c0_45, %c0_46] : memref<1x1x32xf32, #tpu.memory_space<vmem>>, vector<1x1x32xf32>
    %119 = vector.shape_cast %118 : vector<1x1x32xf32> to vector<1x32xf32>
    %120 = vector.broadcast %119 : vector<1x32xf32> to vector<16x32xf32>
    %121 = arith.addf %117, %120 : vector<16x32xf32>
    %122 = arith.addf %3, %121 : vector<16x32xf32>
    %c0_47 = arith.constant 0 : index
    %c0_48 = arith.constant 0 : index
    %c0_49 = arith.constant 0 : index
    %123 = vector.load %arg13[%c0_47, %c0_48, %c0_49] : memref<1x1x32xf32, #tpu.memory_space<vmem>>, vector<1x1x32xf32>
    %124 = vector.shape_cast %123 : vector<1x1x32xf32> to vector<1x32xf32>
    %c0_50 = arith.constant 0 : index
    %c0_51 = arith.constant 0 : index
    %c0_52 = arith.constant 0 : index
    %125 = vector.load %arg14[%c0_50, %c0_51, %c0_52] : memref<1x1x32xf32, #tpu.memory_space<vmem>>, vector<1x1x32xf32>
    %126 = vector.shape_cast %125 : vector<1x1x32xf32> to vector<1x32xf32>
    %cst_53 = arith.constant dense<0.000000e+00> : vector<16xf32>
    %127 = vector.multi_reduction <add>, %122, %cst_53 [1] : vector<16x32xf32> to vector<16xf32>
    %128 = vector.shape_cast %127 : vector<16xf32> to vector<16x1xf32>
    %cst_54 = arith.constant 3.200000e+01 : f32
    %129 = vector.broadcast %cst_54 : f32 to vector<16x1xf32>
    %130 = arith.divf %128, %129 : vector<16x1xf32>
    %131 = vector.broadcast %130 : vector<16x1xf32> to vector<16x32xf32>
    %132 = arith.subf %122, %131 : vector<16x32xf32>
    %133 = arith.mulf %132, %132 : vector<16x32xf32>
    %cst_55 = arith.constant dense<0.000000e+00> : vector<16xf32>
    %134 = vector.multi_reduction <add>, %133, %cst_55 [1] : vector<16x32xf32> to vector<16xf32>
    %135 = vector.shape_cast %134 : vector<16xf32> to vector<16x1xf32>
    %cst_56 = arith.constant 3.200000e+01 : f32
    %136 = vector.broadcast %cst_56 : f32 to vector<16x1xf32>
    %137 = arith.divf %135, %136 : vector<16x1xf32>
    %138 = vector.broadcast %130 : vector<16x1xf32> to vector<16x32xf32>
    %139 = arith.subf %122, %138 : vector<16x32xf32>
    %cst_57 = arith.constant 9.99999974E-6 : f32
    %140 = vector.broadcast %cst_57 : f32 to vector<16x1xf32>
    %141 = arith.addf %137, %140 : vector<16x1xf32>
    %142 = math.rsqrt %141 : vector<16x1xf32>
    %143 = vector.broadcast %142 : vector<16x1xf32> to vector<16x32xf32>
    %144 = arith.mulf %139, %143 : vector<16x32xf32>
    %145 = vector.broadcast %124 : vector<1x32xf32> to vector<16x32xf32>
    %146 = arith.mulf %144, %145 : vector<16x32xf32>
    %147 = vector.broadcast %126 : vector<1x32xf32> to vector<16x32xf32>
    %148 = arith.addf %146, %147 : vector<16x32xf32>
    %149 = arith.truncf %148 : vector<16x32xf32> to vector<16x32xbf16>
    %c0_58 = arith.constant 0 : index
    %c0_59 = arith.constant 0 : index
    %c0_60 = arith.constant 0 : index
    %150 = vector.load %arg15[%c0_58, %c0_59, %c0_60] : memref<1x32x64xbf16, #tpu.memory_space<vmem>>, vector<1x32x64xbf16>
    %151 = vector.shape_cast %150 : vector<1x32x64xbf16> to vector<32x64xbf16>
    %cst_61 = arith.constant dense<0.000000e+00> : vector<16x64xf32>
    %152 = tpu.matmul %149, %151, %cst_61 {dimension_numbers = #tpu.dot_dimension_numbers<[1], [0], [0], [1], [0, 0, 1, 1], [], []>} : vector<16x32xbf16>, vector<32x64xbf16>, vector<16x64xf32> -> vector<16x64xf32>
    %c0_62 = arith.constant 0 : index
    %c0_63 = arith.constant 0 : index
    %c0_64 = arith.constant 0 : index
    %153 = vector.load %arg16[%c0_62, %c0_63, %c0_64] : memref<1x1x64xf32, #tpu.memory_space<vmem>>, vector<1x1x64xf32>
    %154 = vector.shape_cast %153 : vector<1x1x64xf32> to vector<1x64xf32>
    %155 = vector.broadcast %154 : vector<1x64xf32> to vector<16x64xf32>
    %156 = arith.addf %152, %155 : vector<16x64xf32>
    %cst_65 = arith.constant 5.000000e-01 : f32
    %157 = vector.broadcast %cst_65 : f32 to vector<16x64xf32>
    %158 = arith.mulf %157, %156 : vector<16x64xf32>
    %cst_66 = arith.constant 4.471500e-02 : f32
    %159 = vector.broadcast %cst_66 : f32 to vector<16x64xf32>
    %160 = arith.mulf %159, %156 : vector<16x64xf32>
    %161 = arith.mulf %160, %156 : vector<16x64xf32>
    %162 = arith.mulf %161, %156 : vector<16x64xf32>
    %163 = arith.addf %156, %162 : vector<16x64xf32>
    %cst_67 = arith.constant 0.797884583 : f32
    %164 = vector.broadcast %cst_67 : f32 to vector<16x64xf32>
    %165 = arith.mulf %164, %163 : vector<16x64xf32>
    %166 = math.tanh %165 : vector<16x64xf32>
    %cst_68 = arith.constant 1.000000e+00 : f32
    %167 = vector.broadcast %cst_68 : f32 to vector<16x64xf32>
    %168 = arith.addf %167, %166 : vector<16x64xf32>
    %169 = arith.mulf %158, %168 : vector<16x64xf32>
    %170 = arith.truncf %169 : vector<16x64xf32> to vector<16x64xbf16>
    %c0_69 = arith.constant 0 : index
    %c0_70 = arith.constant 0 : index
    %c0_71 = arith.constant 0 : index
    %171 = vector.load %arg17[%c0_69, %c0_70, %c0_71] : memref<1x64x32xbf16, #tpu.memory_space<vmem>>, vector<1x64x32xbf16>
    %172 = vector.shape_cast %171 : vector<1x64x32xbf16> to vector<64x32xbf16>
    %cst_72 = arith.constant dense<0.000000e+00> : vector<16x32xf32>
    %173 = tpu.matmul %170, %172, %cst_72 {dimension_numbers = #tpu.dot_dimension_numbers<[1], [0], [0], [1], [0, 0, 1, 1], [], []>} : vector<16x64xbf16>, vector<64x32xbf16>, vector<16x32xf32> -> vector<16x32xf32>
    %c0_73 = arith.constant 0 : index
    %c0_74 = arith.constant 0 : index
    %c0_75 = arith.constant 0 : index
    %174 = vector.load %arg18[%c0_73, %c0_74, %c0_75] : memref<1x1x32xf32, #tpu.memory_space<vmem>>, vector<1x1x32xf32>
    %175 = vector.shape_cast %174 : vector<1x1x32xf32> to vector<1x32xf32>
    %176 = vector.broadcast %175 : vector<1x32xf32> to vector<16x32xf32>
    %177 = arith.addf %173, %176 : vector<16x32xf32>
    %178 = arith.addf %122, %177 : vector<16x32xf32>
    %c0_76 = arith.constant 0 : index
    %c0_77 = arith.constant 0 : index
    %179 = vector.load %arg22[%c0_76, %c0_77] : memref<16x32xf32, #tpu.memory_space<vmem>>, vector<16x32xf32>
    tpu.vector_store %arg22[%c0_76, %c0_77], %178 {strides = array<i32>} : memref<16x32xf32, #tpu.memory_space<vmem>>, vector<16x32xf32>,
    %c1_i32 = arith.constant 1 : i32
    %180 = arith.cmpi eq, %arg1, %c1_i32 : i32
    %181 = arith.extui %180 : i1 to i32
    %c0_i32_78 = arith.constant 0 : i32
    %182 = arith.cmpi ne, %181, %c0_i32_78 : i32
    scf.if %182 {
      %c0_79 = arith.constant 0 : index
      %c0_80 = arith.constant 0 : index
      %183 = vector.load %arg19[%c0_79, %c0_80] : memref<1x32xf32, #tpu.memory_space<vmem>>, vector<1x32xf32>
      %184 = vector.shape_cast %183 : vector<1x32xf32> to vector<32xf32>
      %c0_81 = arith.constant 0 : index
      %c0_82 = arith.constant 0 : index
      %185 = vector.load %arg20[%c0_81, %c0_82] : memref<1x32xf32, #tpu.memory_space<vmem>>, vector<1x32xf32>
      %186 = vector.shape_cast %185 : vector<1x32xf32> to vector<32xf32>
      %cst_83 = arith.constant dense<0.000000e+00> : vector<16xf32>
      %187 = vector.multi_reduction <add>, %178, %cst_83 [1] : vector<16x32xf32> to vector<16xf32>
      %188 = vector.shape_cast %187 : vector<16xf32> to vector<16x1xf32>
      %cst_84 = arith.constant 3.200000e+01 : f32
      %189 = vector.broadcast %cst_84 : f32 to vector<16x1xf32>
      %190 = arith.divf %188, %189 : vector<16x1xf32>
      %191 = vector.broadcast %190 : vector<16x1xf32> to vector<16x32xf32>
      %192 = arith.subf %178, %191 : vector<16x32xf32>
      %193 = arith.mulf %192, %192 : vector<16x32xf32>
      %cst_85 = arith.constant dense<0.000000e+00> : vector<16xf32>
      %194 = vector.multi_reduction <add>, %193, %cst_85 [1] : vector<16x32xf32> to vector<16xf32>
      %195 = vector.shape_cast %194 : vector<16xf32> to vector<16x1xf32>
      %cst_86 = arith.constant 3.200000e+01 : f32
      %196 = vector.broadcast %cst_86 : f32 to vector<16x1xf32>
      %197 = arith.divf %195, %196 : vector<16x1xf32>
      %198 = vector.broadcast %190 : vector<16x1xf32> to vector<16x32xf32>
      %199 = arith.subf %178, %198 : vector<16x32xf32>
      %cst_87 = arith.constant 9.99999974E-6 : f32
      %200 = vector.broadcast %cst_87 : f32 to vector<16x1xf32>
      %201 = arith.addf %197, %200 : vector<16x1xf32>
      %202 = math.rsqrt %201 : vector<16x1xf32>
      %203 = vector.broadcast %202 : vector<16x1xf32> to vector<16x32xf32>
      %204 = arith.mulf %199, %203 : vector<16x32xf32>
      %205 = vector.shape_cast %184 : vector<32xf32> to vector<1x32xf32>
      %206 = vector.broadcast %205 : vector<1x32xf32> to vector<16x32xf32>
      %207 = arith.mulf %204, %206 : vector<16x32xf32>
      %208 = vector.shape_cast %186 : vector<32xf32> to vector<1x32xf32>
      %209 = vector.broadcast %208 : vector<1x32xf32> to vector<16x32xf32>
      %210 = arith.addf %207, %209 : vector<16x32xf32>
      %c0_88 = arith.constant 0 : index
      %c0_89 = arith.constant 0 : index
      %c0_90 = arith.constant 0 : index
      %211 = vector.load %arg21[%c0_88, %c0_89, %c0_90] : memref<1x16x32xf32, #tpu.memory_space<vmem>>, vector<1x16x32xf32>
      %212 = vector.shape_cast %211 : vector<1x16x32xf32> to vector<16x32xf32>
      %213 = vector.shape_cast %210 : vector<16x32xf32> to vector<1x16x32xf32>
      tpu.vector_store %arg21[%c0_88, %c0_89, %c0_90], %213 {strides = array<i32>} : memref<1x16x32xf32, #tpu.memory_space<vmem>>, vector<1x16x32xf32>,
    } else {
    }
    return
  }
  func.func @transform_0(%arg0: i32, %arg1: i32) -> (i32, i32, i32) {
    %c0_i32 = arith.constant 0 : i32
    %c0_i32_0 = arith.constant 0 : i32
    %c0_i32_1 = arith.constant 0 : i32
    return %arg0, %c0_i32, %c0_i32_0 : i32, i32, i32
  }
  func.func @transform_1(%arg0: i32, %arg1: i32) -> (i32, i32, i32) {
    %c0_i32 = arith.constant 0 : i32
    %c0_i32_0 = arith.constant 0 : i32
    %c0_i32_1 = arith.constant 0 : i32
    return %arg0, %c0_i32, %c0_i32_0 : i32, i32, i32
  }
  func.func @transform_2(%arg0: i32, %arg1: i32) -> (i32, i32, i32) {
    %c0_i32 = arith.constant 0 : i32
    %c0_i32_0 = arith.constant 0 : i32
    %c0_i32_1 = arith.constant 0 : i32
    return %arg0, %c0_i32, %c0_i32_0 : i32, i32, i32
  }
  func.func @transform_3(%arg0: i32, %arg1: i32) -> (i32, i32, i32) {
    %c0_i32 = arith.constant 0 : i32
    %c0_i32_0 = arith.constant 0 : i32
    %c0_i32_1 = arith.constant 0 : i32
    return %arg1, %c0_i32, %c0_i32_0 : i32, i32, i32
  }
  func.func @transform_4(%arg0: i32, %arg1: i32) -> (i32, i32, i32) {
    %c0_i32 = arith.constant 0 : i32
    %c0_i32_0 = arith.constant 0 : i32
    %c0_i32_1 = arith.constant 0 : i32
    return %arg1, %c0_i32, %c0_i32_0 : i32, i32, i32
  }
  func.func @transform_5(%arg0: i32, %arg1: i32) -> (i32, i32, i32) {
    %c0_i32 = arith.constant 0 : i32
    %c0_i32_0 = arith.constant 0 : i32
    %c0_i32_1 = arith.constant 0 : i32
    return %arg1, %c0_i32, %c0_i32_0 : i32, i32, i32
  }
  func.func @transform_6(%arg0: i32, %arg1: i32) -> (i32, i32, i32) {
    %c0_i32 = arith.constant 0 : i32
    %c0_i32_0 = arith.constant 0 : i32
    %c0_i32_1 = arith.constant 0 : i32
    return %arg1, %c0_i32, %c0_i32_0 : i32, i32, i32
  }
  func.func @transform_7(%arg0: i32, %arg1: i32) -> (i32, i32, i32) {
    %c0_i32 = arith.constant 0 : i32
    %c0_i32_0 = arith.constant 0 : i32
    %c0_i32_1 = arith.constant 0 : i32
    return %arg1, %c0_i32, %c0_i32_0 : i32, i32, i32
  }
  func.func @transform_8(%arg0: i32, %arg1: i32) -> (i32, i32, i32) {
    %c0_i32 = arith.constant 0 : i32
    %c0_i32_0 = arith.constant 0 : i32
    %c0_i32_1 = arith.constant 0 : i32
    return %arg1, %c0_i32, %c0_i32_0 : i32, i32, i32
  }
  func.func @transform_9(%arg0: i32, %arg1: i32) -> (i32, i32, i32) {
    %c0_i32 = arith.constant 0 : i32
    %c0_i32_0 = arith.constant 0 : i32
    %c0_i32_1 = arith.constant 0 : i32
    return %arg1, %c0_i32, %c0_i32_0 : i32, i32, i32
  }
  func.func @transform_10(%arg0: i32, %arg1: i32) -> (i32, i32, i32) {
    %c0_i32 = arith.constant 0 : i32
    %c0_i32_0 = arith.constant 0 : i32
    %c0_i32_1 = arith.constant 0 : i32
    return %arg1, %c0_i32, %c0_i32_0 : i32, i32, i32
  }
  func.func @transform_11(%arg0: i32, %arg1: i32) -> (i32, i32, i32) {
    %c0_i32 = arith.constant 0 : i32
    %c0_i32_0 = arith.constant 0 : i32
    %c0_i32_1 = arith.constant 0 : i32
    return %arg1, %c0_i32, %c0_i32_0 : i32, i32, i32
  }
  func.func @transform_12(%arg0: i32, %arg1: i32) -> (i32, i32, i32) {
    %c0_i32 = arith.constant 0 : i32
    %c0_i32_0 = arith.constant 0 : i32
    %c0_i32_1 = arith.constant 0 : i32
    return %arg1, %c0_i32, %c0_i32_0 : i32, i32, i32
  }
  func.func @transform_13(%arg0: i32, %arg1: i32) -> (i32, i32, i32) {
    %c0_i32 = arith.constant 0 : i32
    %c0_i32_0 = arith.constant 0 : i32
    %c0_i32_1 = arith.constant 0 : i32
    return %arg1, %c0_i32, %c0_i32_0 : i32, i32, i32
  }
  func.func @transform_14(%arg0: i32, %arg1: i32) -> (i32, i32, i32) {
    %c0_i32 = arith.constant 0 : i32
    %c0_i32_0 = arith.constant 0 : i32
    %c0_i32_1 = arith.constant 0 : i32
    return %arg1, %c0_i32, %c0_i32_0 : i32, i32, i32
  }
  func.func @transform_15(%arg0: i32, %arg1: i32) -> (i32, i32, i32) {
    %c0_i32 = arith.constant 0 : i32
    %c0_i32_0 = arith.constant 0 : i32
    %c0_i32_1 = arith.constant 0 : i32
    return %arg1, %c0_i32, %c0_i32_0 : i32, i32, i32
  }
  func.func @transform_16(%arg0: i32, %arg1: i32) -> (i32, i32, i32) {
    %c0_i32 = arith.constant 0 : i32
    %c0_i32_0 = arith.constant 0 : i32
    %c0_i32_1 = arith.constant 0 : i32
    return %arg1, %c0_i32, %c0_i32_0 : i32, i32, i32
  }
  func.func @transform_17(%arg0: i32, %arg1: i32) -> (i32, i32) {
    %c0_i32 = arith.constant 0 : i32
    %c0_i32_0 = arith.constant 0 : i32
    %c0_i32_1 = arith.constant 0 : i32
    return %c0_i32, %c0_i32_0 : i32, i32
  }
  func.func @transform_18(%arg0: i32, %arg1: i32) -> (i32, i32) {
    %c0_i32 = arith.constant 0 : i32
    %c0_i32_0 = arith.constant 0 : i32
    %c0_i32_1 = arith.constant 0 : i32
    return %c0_i32, %c0_i32_0 : i32, i32
  }
  func.func @transform_19(%arg0: i32, %arg1: i32) -> (i32, i32, i32) {
    %c0_i32 = arith.constant 0 : i32
    %c0_i32_0 = arith.constant 0 : i32
    %c0_i32_1 = arith.constant 0 : i32
    return %arg0, %c0_i32, %c0_i32_0 : i32, i32, i32
  }
}

</mosaic_0001>

<bundles_post_ra>
// kernel: tpu_custom_call.1
= control target key start
LH: loop header
LB: loop body
LE: loop exit
PB: predicated region body
PF: predicated region fallthrough
CT: control target
= control target key end

     0   :  { %s3586_s0 = inlined_call_operand.vmem [shape: f32[2,16,32], index: 0, kind: input, shape index: {}]   ;;  %s3587_s1 = inlined_call_operand.vmem [shape: f32[2,16,32], index: 1, kind: input, shape index: {}]   ;;  %s3588_s2 = inlined_call_operand.hbm [shape: f32[2,1,16], index: 2, kind: input, shape index: {}]   ;;  %s3589_s3 = inlined_call_operand.hbm [shape: f32[2,1,32], index: 3, kind: input, shape index: {}]   ;;  %s3590_s4 = inlined_call_operand.vmem [shape: f32[2,1,32], index: 4, kind: input, shape index: {}]   ;;  %s3591_s5 = inlined_call_operand.vmem [shape: bf16[2,32,64], index: 5, kind: input, shape index: {}]   ;;  %s3592_s6 = inlined_call_operand.vmem [shape: f32[2,1,64], index: 6, kind: input, shape index: {}]   ;;  %s3593_s7 = inlined_call_operand.hbm [shape: bf16[2,32,32], index: 7, kind: input, shape index: {}]   ;;  %s3594_s8 = inlined_call_operand.vmem [shape: f32[2,1,32], index: 8, kind: input, shape index: {}]   ;;  %s3595_s9 = inlined_call_operand.hbm [shape: bf16[2,32,32], index: 9, kind: input, shape index: {}]   ;;  %s3596_s10 = inlined_call_operand.vmem [shape: f32[2,1,32], index: 10, kind: input, shape index: {}]   ;;  %s3597_s11 = inlined_call_operand.hbm [shape: f32[2,1,32], index: 11, kind: input, shape index: {}]   ;;  %s3598_s12 = inlined_call_operand.vmem [shape: f32[2,1,32], index: 12, kind: input, shape index: {}]   ;;  %s3599_s13 = inlined_call_operand.hbm [shape: bf16[2,32,64], index: 13, kind: input, shape index: {}]   ;;  %s3600_s14 = inlined_call_operand.vmem [shape: f32[2,1,64], index: 14, kind: input, shape index: {}]   ;;  %s3601_s15 = inlined_call_operand.vmem [shape: bf16[2,64,32], index: 15, kind: input, shape index: {}]   ;;  %s3602_s16 = inlined_call_operand.vmem [shape: f32[2,1,32], index: 16, kind: input, shape index: {}]   ;;  %s3603_s17 = inlined_call_operand.vmem [shape: f32[1,32], index: 17, kind: input, shape index: {}]   ;;  %s3604_s18 = inlined_call_operand.vmem [shape: f32[1,32], index: 18, kind: input, shape index: {}]   ;;  %s3605_s19 = inlined_call_operand.hbm [shape: f32[2,16,32], index: 19, kind: output, shape index: {}]  }
   0x1   :  { %3630 = sst [smem:[#allocation38_spill]] %s3586_s0 }
   0x2   :  { %3631 = sst [smem:[#allocation39_spill]] %s3587_s1 }
   0x3   :  { %3632 = sst [smem:[#allocation40_spill]] %s3588_s2 }
   0x4   :  { %3633 = sst [smem:[#allocation41_spill]] %s3589_s3 }
   0x5   :  { %3634 = sst [smem:[#allocation42_spill]] %s3590_s4 }
   0x6   :  { %3635 = sst [smem:[#allocation43_spill]] %s3591_s5 }
   0x7   :  { %3636 = sst [smem:[#allocation44_spill]] %s3592_s6 }
   0x8   :  { %3637 = sst [smem:[#allocation45_spill]] %s3593_s7 }
   0x9   :  { %3638 = sst [smem:[#allocation46_spill]] %s3594_s8 }
   0xa   :  { %3639 = sst [smem:[#allocation47_spill]] %s3595_s9 }
   0xb   :  { %3640 = sst [smem:[#allocation48_spill]] %s3596_s10 }
   0xc   :  { %3641 = sst [smem:[#allocation49_spill]] %s3597_s11 }
   0xd   :  { %3642 = sst [smem:[#allocation50_spill]] %s3598_s12 }
   0xe   :  { %3643 = sst [smem:[#allocation51_spill]] %s3599_s13 }
   0xf   :  { %3644 = sst [smem:[#allocation52_spill]] %s3600_s14 }
  0x10   :  { %3645 = sst [smem:[#allocation53_spill]] %s3601_s15 }
  0x11   :  { %3646 = sst [smem:[#allocation54_spill]] %s3602_s16 }
  0x12   :  { %3647 = sst [smem:[#allocation55_spill]] %s3603_s17 }
  0x13   :  { %3648 = sst [smem:[#allocation56_spill]] %s3604_s18 }
  0x14   :  { %3649 = sst [smem:[#allocation57_spill]] %s3605_s19 }
  0x15   :  { %24 = vsyncpa [#allocation4], 0 }
  0x16   :  { %26 = vsyncpa [#allocation4 + $0x1], 0 }
  0x17   :  { %27 = vsyncpa [#allocation7], 0 }
  0x18   :  { %29 = vsyncpa [#allocation7 + $0x1], 0 }
  0x19   :  { %30 = vsyncpa [#allocation10], 0 }
  0x1a   :  { %32 = vsyncpa [#allocation10 + $0x1], 0 }
  0x1b   :  { %33 = vsyncpa [#allocation13], 0 }
  0x1c   :  { %35 = vsyncpa [#allocation13 + $0x1], 0 }
  0x1d   :  { %36 = vsyncpa [#allocation5], 0 }
  0x1e   :  { %38 = vsyncpa [#allocation5 + $0x1], 0  ;;  %s2981_s0 = smov 0   ;;  %s2983_s30 = smov 0  }
  0x1f   :  { %s2985_s20 = smov 0   ;;  %s2987_s21 = smov 0  }
  0x20   :  { %s2989_s1 = smov 0   ;;  %s2991_s22 = smov 0  }
  0x21   :  { %s2993_s2 = smov 0   ;;  %s2995_s23 = smov 0  }
  0x22   :  { %s2997_s24 = smov 0   ;;  %s2999_s25 = smov 0  }
  0x23   :  { %s3001_s3 = smov 0  }
  0x24 LB: > { %3650 = sst [smem:[#allocation20_spill]] %s2831_s30  ;;  %s53_s26 = sadd.s32 1, %s2859_s24  ;;  %s2867_s3 = sphi %s3001_s3, %s44_s3   ;;  %s2863_s25 = sphi %s2999_s25, %s3738_s25   ;;  %s2859_s24 = sphi %s2997_s24, %s3737_s24   ;;  %s2855_s23 = sphi %s2995_s23, %s3736_s23   ;;  %s2851_s2 = sphi %s2993_s2, %s3735_s2   ;;  %s2847_s22 = sphi %s2991_s22, %s3734_s22   ;;  %s2843_s1 = sphi %s2989_s1, %s3733_s1   ;;  %s2839_s21 = sphi %s2987_s21, %s3732_s21   ;;  %s2835_s20 = sphi %s2985_s20, %s3731_s20   ;;  %s2831_s30 = sphi %s2983_s30, %s3730_s30   ;;  %s2827_s0 = sphi %s2981_s0, %s3729_s0  }
  0x25   : > { %3651 = sst [smem:[#allocation21_spill]] %s2835_s20  ;;  %p123_p0 = scmp.eq.s32.totalorder %s2867_s3, 0 }
  0x26   : > { %3652 = sst [smem:[#allocation22_spill]] %s2839_s21  ;;  %p3038_p1 = scmp.ge.s32.totalorder %s53_s26, 2 }
  0x27   : > { %3653 = sst [smem:[#allocation23_spill]] %s2843_s1  ;;  %s141_s28 = sadd.s32 1, %s2835_s20 }
  0x28   : > { %3654 = sst [smem:[#allocation24_spill]] %s2847_s22  ;;  %p148_p2 = scmp.ne.s32.totalorder %s2835_s20, %s2831_s30 }
  0x29   : > { %3655 = sst [smem:[#allocation25_spill]] %s2851_s2  ;;  %p154_p3 = scmp.ne.s32.totalorder %s2831_s30, %s2827_s0 }
  0x2a   : > { %3656 = sst [smem:[#allocation26_spill]] %s2855_s23  ;;  %s3740_s26 = smov (%p3038_p1, %s53_s26), 0 }
  0x2b   : > { %3657 = sst [smem:[#allocation27_spill]] %s2859_s24  ;;  %p3053_p4 = por %p148_p2, %p123_p0 }
  0x2c   : > { %3658 = sst [smem:[#allocation28_spill]] %s2863_s25  ;;  %s138_s19 = ssub.s32 %s2859_s24, %s3740_s26 }
  0x2d   : > { %3659 = sst [smem:[#allocation29_spill]] %s2867_s3  ;;  %p2375_p5 = scmp.lt.s32.totalorder %s2867_s3, 4 }
  0x2e   : > { %3661 = sst [smem:[#allocation30_spill]] %s3740_s26  ;;  %p139_p6 = scmp.eq.s32.totalorder %s138_s19, 0 }
  0x2f   : > { %s623_s18 = sand.u32 1, %s2867_s3   ;;  %s3062_s17 = sand.u32 1, %s2835_s20  }
  0x30   : > { %s3065_s15 = scalar_select %p139_p6, %s2835_s20, %s141_s28  }
  0x31   : > { %s3664_s12 = sld [smem:[#allocation41_spill]]  ;;  %s626_s6 = scalar_lea.vmem [#allocation6], %s3062_s17 }
  0x32   : > { %3663 = sst [smem:[#allocation31_spill]] %s3065_s15  ;;  %s633_s5 = sshll.u32 %s626_s6, 4  ;;  %s634_s5 = int_to_ptr.vmem [resolvable:$true] %s633_s5 }
  0x33   : > { %p3076_p7 = pnand %p2375_p5, %p3053_p4  ;;  %p2237_p8 = scmp.ge.s32.totalorder %s2867_s3, 1 }
  0x34   : > { %p779_p9 = scmp.lt.s32.totalorder %s2867_s3, 5  ;;  %s3083_s28 = sshll.u32 %s3062_s17, 4 }
  0x35   : > { %s3667_s9 = sld [smem:[#allocation47_spill]]  ;;  %s3102_s15 = scalar_lea.sflag [#allocation10], %s623_s18 }
  0x36   : > { %p3090_p10 = pnand %p2237_p8, %p779_p9  ;;  %s3609_s20 = smov 64  }
  0x37   : > { %s629_s10 = scalar_lea.hbm %s3664_s12, %s2859_s24  ;;  %s3095_s12 = sshll.u32 %s2859_s24, 4 }
  0x38   : > { %s631_s8 = sshll.u32 %s629_s10, 4  ;;  %s3085_s10 = scalar_lea.sflag [#allocation7], %s623_s18  ;;  %s632_s8 = int_to_ptr.hbm [resolvable:$true] %s631_s8 }
  0x39   : > { %2358 = dma.hbm_to_vmem [thread:$0]  (!%p3076_p7), %s632_s8, 16, %s634_s5, %s3085_s10  }
  0x3a   : > { %s692_s5 = scalar_lea.vmem [#allocation9], %s3083_s28  ;;  %s3611_s14 = smov 4  }
  0x3b   : > { %s697_s29 = scalar_lea.hbm %s3667_s9, %s3095_s12  ;;  %s700_s8 = sshll.u32 %s692_s5, 4  ;;  %s701_s8 = int_to_ptr.vmem [resolvable:$true] %s700_s8 }
  0x3c   : > { %s698_s26 = sshll.u32 %s697_s29, 4  ;;  %s3111_s16 = sadd.s32 4294967295, %s2867_s3   ;;  %s699_s26 = int_to_ptr.hbm [resolvable:$true] %s698_s26 }
  0x3d   : > { %2364 = dma.hbm_to_vmem [thread:$0]  (!%p3076_p7), %s699_s26, 256, %s701_s8, %s3102_s15, %s3609_s20, %s3609_s20, %s3611_s14  }
  0x3e   : > { %3668 = sst [smem:[#allocation32_spill]] %s3111_s16  ;;  %s2225_s29 = sadd.s32 4294967294, %s2867_s3  }
  0x3f   : > { %s56_s18 = sadd.s32 1, %s2863_s25  ;;  %s115_s5 = sadd.s32 1, %s2847_s22 }
  0x40   : > { %s3742_s18 = smov (!%p3038_p1, %s56_s18), %s2863_s25  ;;  %p122_p11 = scmp.ne.s32.totalorder %s2847_s22, %s2843_s1 }
  0x41   : > { %p128_p12 = scmp.ne.s32.totalorder %s2843_s1, %s2839_s21  ;;  %p58_p13 = scmp.ge.s32.totalorder %s3742_s18, 2 }
  0x42   : > { %p129_p2 = scmp.eq.s32.totalorder %s3111_s16, 0  ;;  %p3126_p4 = por %p123_p0, %p122_p11 }
  0x43   : > { %p558_p6 = scmp.eq.s32.totalorder %s3111_s16, 3  ;;  %s3744_s18 = smov (%p58_p13, %s3742_s18), 0 }
  0x44   : > { %3670 = sst [smem:[#allocation33_spill]] %s3744_s18  ;;  %p3136_p1 = por %p129_p2, %p128_p12 }
  0x45   : > { %p3143_p8 = por %p154_p3, %p129_p2  ;;  %s112_s20 = ssub.s32 %s2863_s25, %s3744_s18 }
  0x46   : > { %s3671_s27 = scalar_select %p3136_p1, 1, 0 }
  0x47   : > { %p3149_p0 = por %p558_p6, %p122_p11  ;;  %p113_p9 = scmp.eq.s32.totalorder %s112_s20, 0 }
  0x48   : > { %3672 = sst [smem:[#allocation34_spill]] %s3671_s27  ;;  %p564_p13 = scmp.eq.s32.totalorder %s2225_s29, 3 }
  0x49   : > { %s3674_s14 = scalar_select %p3149_p0, 1, 0 }
  0x4a   : > { %s606_s9 = sand.u32 1, %s2847_s22   ;;  %s3676_s23 = sld [smem:[#allocation40_spill]] }
  0x4b   : > { %3675 = sst [smem:[#allocation35_spill]] %s3674_s14  ;;  %p3164_p3 = por %p564_p13, %p128_p12 }
  0x4c   : > { %s3159_s27 = scalar_select %p113_p9, %s2847_s22, %s115_s5  }
  0x4d   : > { %s3678_s0 = scalar_select %p3164_p3, 1, 0 }
  0x4e   : > { %3677 = sst [smem:[#allocation36_spill]] %s3159_s27  ;;  %s609_s20 = scalar_lea.vmem [#allocation3], %s606_s9 }
  0x4f   : > { %3679 = sst [smem:[#allocation37_spill]] %s3678_s0  ;;  %s616_s29 = sshll.u32 %s609_s20, 4  ;;  %s617_s29 = int_to_ptr.vmem [resolvable:$true] %s616_s29 }
  0x50   : > { %s612_s16 = scalar_lea.hbm %s3676_s23, %s2863_s25  ;;  %p2353_p11 = pnand %p2375_p5, %p3126_p4 }
  0x51   : > { %s614_s18 = sshll.u32 %s612_s16, 4  ;;  %s3680_s7 = sld [smem:[#allocation45_spill]]  ;;  %s615_s18 = int_to_ptr.hbm [resolvable:$true] %s614_s18 }
  0x52   : > { %s607_s25 = scalar_lea.sflag [#allocation4], %s606_s9  ;;  %s664_s16 = scalar_lea.vmem [#allocation8], %s3083_s28 }
  0x53   : > { %2355 = dma.hbm_to_vmem [thread:$0]  (!%p2353_p11), %s615_s18, 16, %s617_s29, %s607_s25  }
  0x54   : > { %s672_s27 = sshll.u32 %s664_s16, 4  ;;  %s3681_s26 = smov 4   ;;  %s673_s27 = int_to_ptr.vmem [resolvable:$true] %s672_s27 }
  0x55   : > { %s3682_s20 = smov 64   ;;  %s3683_s11 = sld [smem:[#allocation49_spill]] }
  0x56   : > { %s719_s22 = scalar_lea.vmem [#allocation11], %s3062_s17  ;;  %s3684_s13 = sld [smem:[#allocation51_spill]] }
  0x57   : > { %s669_s23 = scalar_lea.hbm %s3680_s7, %s3095_s12  ;;  %s743_s0 = scalar_lea.vmem [#allocation12], %s3083_s28 }
  0x58   : > { %s670_s5 = sshll.u32 %s669_s23, 4  ;;  %s726_s23 = sshll.u32 %s719_s22, 4  ;;  %s671_s5 = int_to_ptr.hbm [resolvable:$true] %s670_s5  ;;  %s727_s23 = int_to_ptr.vmem [resolvable:$true] %s726_s23 }
  0x59   : > { %2361 = dma.hbm_to_vmem [thread:$0]  (!%p3076_p7), %s671_s5, 256, %s673_s27, %s3085_s10, %s3682_s20, %s3682_s20, %s3681_s26  }
  0x5a   : > { %s751_s21 = sshll.u32 %s743_s0, 4  ;;  %s740_s10 = scalar_lea.sflag [#allocation13], %s3062_s17  ;;  %s752_s21 = int_to_ptr.vmem [resolvable:$true] %s751_s21 }
  0x5b   : > { %s722_s7 = scalar_lea.hbm %s3683_s11, %s2859_s24  ;;  %783 = sbr.rel (%p3090_p10) target bundleno = 2476 (0x9ac), region = 96 }
  0x5c   : > { %s724_s9 = sshll.u32 %s722_s7, 4  ;;  %s748_s29 = scalar_lea.hbm %s3684_s13, %s3095_s12  ;;  %s725_s9 = int_to_ptr.hbm [resolvable:$true] %s724_s9 }
  0x5d   : > { %2367 = dma.hbm_to_vmem [thread:$0]  (!%p3076_p7), %s725_s9, 16, %s727_s23, %s3102_s15  }
  0x5e   : > { %s749_s16 = sshll.u32 %s748_s29, 4  ;;  %s3205_s15 = sand.u32 (!%p3090_p10), 1, %s2843_s1   ;;  %s750_s16 = int_to_ptr.hbm [resolvable:$true] %s749_s16 }
  0x5f   : > { %2370 = dma.hbm_to_vmem [thread:$0]  (!%p3076_p7), %s750_s16, 256, %s752_s21, %s740_s10, %s3682_s20, %s3682_s20, %s3681_s26  }
  0x60   : > { %s786_s22 = scalar_lea.sflag [#allocation4], %s3205_s15 }
  0x61   : > { %2806 = dma.done.wait (%p3136_p1), %s786_s22, 16  }
  0x62   : > { %2808 = vsyncadd (%p3136_p1), %s786_s22, 4294967280  ;;  %s3686_s17 = sld [smem:[#allocation32_spill]]  ;;  %s3215_s19 = sand.u32 1, %s2831_s30  }
  0x68   : > { %s794_s21 = sand.u32 1, %s3686_s17  }
  0x69   : > { %s795_s6 = scalar_lea.sflag [#allocation7], %s794_s21 }
  0x6a   : > { %2810 = dma.done.wait (%p3143_p8), %s795_s6, 272  }
  0x6b   : > { %2812 = vsyncadd (%p3143_p8), %s795_s6, 4294967024  ;;  %s3223_s27 = sshll.u32 %s3215_s19, 4  ;;  %s814_s5 = scalar_lea.sflag [#allocation10], %s794_s21 }
  0x6c   : > { %2814 = dma.done.wait (%p3143_p8), %s814_s5, 272  }
  0x6d   : > { %2816 = vsyncadd (%p3143_p8), %s814_s5, 4294967024  ;;  %s833_s4 = scalar_lea.sflag [#allocation13], %s3215_s19 }
  0x6e   : > { %2818 = dma.done.wait (%p3143_p8), %s833_s4, 256  }
  0x6f   : > { %2820 = vsyncadd (%p3143_p8), %s833_s4, 4294967040  ;;  %s3687_s23 = sld [smem:[#allocation26_spill]]  ;;  %s2241_s25 = sshll.u32 %s3205_s15, 4 }
  0x70   : > { %s3688_s9 = sld [smem:[#allocation25_spill]] }
  0x71   : > { %s3689_s10 = sld [smem:[#allocation38_spill]] }
  0x72   : > { %s3690_s21 = sld [smem:[#allocation39_spill]] }
  0x73   : > { %s3692_s0 = sld [smem:[#allocation43_spill]] }
  0x74   : > { %s3694_s1 = sld [smem:[#allocation46_spill]] }
  0x75   : > { %p955_p5 = scmp.lt.s32.totalorder %s3687_s23, 1  ;;  %s3696_s4 = sld [smem:[#allocation50_spill]] }
  0x76   : > { %p965_p7 = scmp.lt.s32.totalorder %s3688_s9, 1  ;;  %s3697_s12 = sld [smem:[#allocation52_spill]] }
  0x77   : > { %s3746_s23 = smov (!%p955_p5, %s3687_s23), 1  ;;  %s3698_s24 = sld [smem:[#allocation54_spill]] }
  0x78   : > { %s3243_s18 = scalar_select %p965_p7, %s3688_s9, 1 }
  0x79   : > { %s2321_s8 = sshll.u32 %s3746_s23, 4  ;;  %p2250_p10 = scmp.ne.s32.totalorder %s3688_s9, 0 }
  0x7a   : > { %s959_s7 = scalar_lea.vmem %s3689_s10, %s2321_s8  ;;  %s3251_s6 = scalar_lea.vmem %s3690_s21, %s2321_s8 }
  0x7b   : > { %s2323_s26 = sshll.u32 %s3243_s18, 4  ;;  %s978_s22 = scalar_lea.vmem %s3694_s1, %s3243_s18 }
  0x7c   : > { %s3261_s11 = scalar_lea.vmem %s3692_s0, %s2323_s26  ;;  %s3695_s21 = sld [smem:[#allocation48_spill]] }
  0x7d   : > { %s984_s2 = scalar_lea.vmem %s3696_s4, %s3243_s18  ;;  %s987_s0 = scalar_lea.vmem %s3697_s12, %s3243_s18 }
  0x7e   : > { %s2324_s26 = sshll.u32 %s3243_s18, 5  ;;  %s995_s23 = scalar_lea.vmem %s3698_s24, %s3243_s18 }
  0x7f   : > { %s3699_s1 = sld [smem:[#allocation53_spill]]  ;;  %s3293_s8 = scalar_lea.vmem [#allocation14], %s2241_s25 }
  0x81   : > { %1000 = sbr.rel (%p2250_p10) target bundleno = 137 (0x89), region = 124 }
  0x82   : > { %s981_s30 = scalar_lea.vmem %s3695_s21, %s3243_s18 }
  0x85   : > { %s3291_s10 = scalar_lea.vmem %s3699_s1, %s2324_s26 }
  0x86   : > { %v1001_v0 = vld [vmem:[%s959_s7] sm:$0xff]  ;;  %vm1003_vm0 = vcmask 261120   ;;  %v1002_v1 = vld [vmem:[%s959_s7 + $0x8] sm:$0xff] }
  0x87   : > { %1004 = vst.msk [vmem:[#allocation2] sm:$0xff] %vm1003_vm0, %v1001_v0 }
  0x88   : > { %1005 = vst.msk [vmem:[#allocation2 + $0x8] sm:$0xff] %vm1003_vm0, %v1002_v1 }
  0x89 PF: > { %vm1015_vm1 = vcmask 261120   ;;  %v2871_v6 = vmov 32.0   ;;  %s3700_s3 = scalar_lea.vmem [#allocation8], %s3223_s27  ;;  %v2326_v24 = vld [vmem:[%s3261_s11 + $0x8] sm:$0xff]  ;;  %v2325_v28 = vld [vmem:[%s3261_s11] sm:$0xff]  ;;  %s3702_s11 = scalar_lea.vmem [#allocation6], %s3215_s19 }
  0x8a   : > { %2501 = vrcp.f32 %v2871_v6  ;;  %v2328_v23 = vld [vmem:[%s3700_s3 + $0x8] sm:$0xff]  ;;  %s3701_s14 = smov %s3700_s3  ;;  %1109 = vmatpush.bf16.msra.mxu0 %v2326_v24  ;;  %s3703_s7 = sld [smem:[#allocation42_spill]]  ;;  %vm1192_vm9 = vcmask 64512   ;;  %vm1307_vm11 = vcmask 130048  }
  0x8b   : > { %1147 = vmatpush.bf16.msra.mxu1 %v2328_v23  ;;  %v2327_v26 = vld [vmem:[%s3701_s14] sm:$0xff]  ;;  %v1009_v55 = vld [vmem:[%s3251_s6 + $0x8] sm:$0xff]  ;;  %s3705_s5 = sld [smem:[#allocation44_spill]]  ;;  %s2872_s4 = smov 112  }
  0x8c   : > { %v2492_v45 = vld [vmem:[%s3702_s11] ss:$0 sm:$0xff]  ;;  %s2874_s13 = smov 104   ;;  %s2875_s24 = smov 96  }
  0x8d   : > { %v1008_v54 = vld [vmem:[%s3251_s6] sm:$0xff]  ;;  %s2873_s6 = smov 120   ;;  %s2877_s16 = smov 16  }
  0x8e   : > { %v3296_v2 = vld [vmem:[#allocation2] sm:$0xff]  ;;  %1110 = vmatpush.bf16.msra.mxu0 %v2325_v28  ;;  %s2878_s1 = smov 8   ;;  %s2879_s3 = smov 24  }
  0x8f   : > { %v1016_v3 = vsel %vm1015_vm1, %v3296_v2, 0.0  ;;  %v3300_v4 = vld [vmem:[#allocation2 + $0x8] sm:$0xff]  ;;  %1148 = vmatpush.bf16.msra.mxu1 %v2327_v26  ;;  %s3711_s14 = scalar_lea.vmem [#allocation9], %s3223_s27 }
  0x90   : > { %1017 = vadd.xlane.f32.xlu0 %v1016_v3  ;;  %v1019_v5 = vsel %vm1015_vm1, %v3300_v4, 0.0  ;;  %v2502_v7 = vpop.eup %2501  ;;  %s3704_s29 = scalar_lea.vmem %s3703_s7, %s3243_s18  ;;  %s3712_s11 = smov %s3711_s14 }
  0x91   : > { %v1023_v8 = vmul.f32 32.0, %v2502_v7  ;;  %vm1027_vm2 = vweird.f32 %v2502_v7  ;;  %v2493_v49 = vld [vmem:[%s3704_s29] ss:$0 sm:$0xff]  ;;  %s3706_s20 = scalar_lea.vmem %s3705_s5, %s3243_s18 }
  0x92   : > { %v2495_v61 = vld [vmem:[%s3706_s20] ss:$0 sm:$0xff] }
  0x93   : > { %v1024_v9 = vsub.f32 1.0, %v1023_v8  ;;  %v2494_v8 = vld [vmem:[%s978_s22] ss:$0 sm:$0xff]  ;;  %s3708_s22 = scalar_lea.vmem [#allocation3], %s3205_s15 }
  0x95   : > { %v1025_v10 = vmul.f32 %v2502_v7, %v1024_v9 }
  0x97   : > { %v1026_v11 = vadd.f32 %v2502_v7, %v1025_v10 }
  0x98   : > { %1020 = vadd.xlane.f32.xlu0 %v1019_v5 }
  0x99   : > { %v3304_v12 = vsel %vm1027_vm2, %v2502_v7, %v1026_v11 }
 0x103   : > { %v1018_v13 = vpop.xlane.xlu0 %1017 }
 0x104   : > { %v1029_v14 = vmul.f32 %v3304_v12, %v1018_v13 }
 0x106   : > { %v1031_v15 = vsub.f32 %v3296_v2, %v1029_v14 }
 0x108   : > { %v1033_v16 = vmul.f32 %v1031_v15, %v1031_v15 }
 0x10a   : > { %v1035_v17 = vsel %vm1015_vm1, %v1033_v16, 0.0 }
 0x10b   : > { %1036 = vadd.xlane.f32.xlu1 %v1035_v17  ;;  %v1021_v18 = vpop.xlane.xlu0 %1020 }
 0x10c   : > { %v1030_v19 = vmul.f32 %v3304_v12, %v1021_v18 }
 0x10e   : > { %v1032_v20 = vsub.f32 %v3300_v4, %v1030_v19 }
 0x110   : > { %v1034_v21 = vmul.f32 %v1032_v20, %v1032_v20 }
 0x112   : > { %v1038_v22 = vsel %vm1015_vm1, %v1034_v21, 0.0 }
 0x113   : > { %1039 = vadd.xlane.f32.xlu1 %v1038_v22 }
 0x17e   : > { %v1037_v25 = vpop.xlane.xlu1 %1036 }
 0x17f   : > { %v1041_v27 = vmul.f32 %v1037_v25, %v3304_v12 }
 0x181   : > { %v1043_v29 = vadd.f32 1e-05, %v1041_v27 }
 0x183   : > { %2503 = vrsqrt.f32 %v1043_v29  ;;  %vm1051_vm4 = vweird.f32 %v1043_v29 }
 0x186   : > { %v1040_v30 = vpop.xlane.xlu1 %1039 }
 0x187   : > { %v1042_v31 = vmul.f32 %v1040_v30, %v3304_v12 }
 0x189   : > { %v2504_v32 = vpop.eup %2503  ;;  %v1044_v33 = vadd.f32 1e-05, %v1042_v31 }
 0x18a   : > { %v1046_v34 = vmul.f32 %v2504_v32, %v1043_v29  ;;  %vm1052_vm3 = vweird.f32 %v2504_v32 }
 0x18b   : > { %2505 = vrsqrt.f32 %v1044_v33  ;;  %vm1053_vm5 = vmor %vm1051_vm4, %vm1052_vm3  ;;  %vm1061_vm7 = vweird.f32 %v1044_v33 }
 0x18c   : > { %v1047_v35 = vmul.f32 %v2504_v32, %v1046_v34 }
 0x18e   : > { %v1048_v36 = vmul.f32 0.5, %v1047_v35 }
 0x190   : > { %v1049_v37 = vsub.f32 1.5, %v1048_v36 }
 0x191   : > { %v2506_v38 = vpop.eup %2505 }
 0x192   : > { %v1050_v39 = vmul.f32 %v2504_v32, %v1049_v37  ;;  %v1056_v40 = vmul.f32 %v2506_v38, %v1044_v33  ;;  %vm1062_vm6 = vweird.f32 %v2506_v38 }
 0x193   : > { %vm1063_vm8 = vmor %vm1061_vm7, %vm1062_vm6 }
 0x194   : > { %v1054_v41 = vsel %vm1053_vm5, %v2504_v32, %v1050_v39  ;;  %v1057_v42 = vmul.f32 %v2506_v38, %v1056_v40 }
 0x195   : > { %v1065_v44 = vmul.f32 %v1054_v41, %v1031_v15 }
 0x196   : > { %v1058_v43 = vmul.f32 0.5, %v1057_v42 }
 0x197   : > { %v1070_v48 = vmul.f32 %v2492_v45, %v1065_v44  ;;  %v2876_v44 = vmov 0.0  }
 0x198   : > { %v1059_v46 = vsub.f32 1.5, %v1058_v43  ;;  %v1010_v43 = vld [vmem:[%s3708_s22] sm:$0x1] }
 0x199   : > { %v1075_v53 = vadd.f32 %v2493_v49, %v1070_v48  ;;  %vm1011_vm10 = vcmp.gt.f32.partialorder %v1010_v43, 0.5 }
 0x19a   : > { %v1060_v47 = vmul.f32 %v2506_v38, %v1059_v46 }
 0x19b   : > { %v1077_v58 = vadd.f32 %v1075_v53, %v1008_v54 }
 0x19c   : > { %v1064_v50 = vsel %vm1063_vm8, %v2506_v38, %v1060_v47 }
 0x19d   : > { %v1066_v51 = vmul.f32 %v1064_v50, %v1032_v20 }
 0x19f   : > { %v1071_v52 = vmul.f32 %v2492_v45, %v1066_v51  ;;  %v1012_v45 = vsel %vm1011_vm10, -3.4028235e+38, %v2876_v44 }
 0x1a0   : > { %v1297_v46 = vperm.slane %v1012_v45, 0 }
 0x1a1   : > { %v1076_v56 = vadd.f32 %v2493_v49, %v1071_v52 }
 0x1a3   : > { %v1117_v57 = vpack.c.bf16 %v1076_v56, %v1075_v53  ;;  %v1078_v59 = vadd.f32 %v1076_v56, %v1009_v55 }
 0x1a5   : > { %2268 = vmatmul.msk.bf16.vlgmr.msra.gmra.mxu1 %vm1015_vm1, %v1117_v57  ;;  %v1079_v60 = vpack.c.bf16 %v1078_v59, %v1077_v58 }
 0x1a7   : > { %2259 = vmatmul.msk.bf16.vlgmr.msra.gmra.mxu0 %vm1015_vm1, %v1079_v60 }
 0x222   : > { %v1150_v10 = vpop.f32.mrf.mxu1 }
 0x223   : > { %v1151_v11 = vadd.f32 %v2494_v8, %v1150_v10 }
 0x224   : > { %v1112_v62 = vpop.f32.mrf.mxu0 }
 0x225   : > { %v1113_v63 = vadd.f32 %v2495_v61, %v1112_v62  ;;  %v3346_v13 = vpack.c.bf16 %v1151_v11, %v1151_v11 }
 0x227   : > { %v1155_v0 = vpack.c.bf16 %v1113_v63, %v1113_v63  ;;  %v1513_v33 = vunpack.c.l.b16 %v3346_v13 }
 0x229   : > { %1165 = vrot.lane.b32.xlu0 %v1155_v0, %s2872_s4  ;;  %1161 = vrot.lane.b32.xlu2 %v1155_v0, %s2873_s6  ;;  %v1187_v7 = vunpack.c.l.b16 %v1155_v0 }
 0x22a   : > { %v1152_v23 = vpop.f32.mrf.mxu1 }
 0x22b   : > { %v1153_v25 = vadd.f32 %v2494_v8, %v1152_v23 }
 0x22c   : > { %v1114_v1 = vpop.f32.mrf.mxu0 }
 0x22d   : > { %v1115_v3 = vadd.f32 %v2495_v61, %v1114_v1  ;;  %v3351_v28 = vpack.c.bf16 %v1153_v25, %v1153_v25 }
 0x22f   : > { %v1156_v5 = vpack.c.bf16 %v1115_v3, %v1115_v3  ;;  %v1514_v32 = vunpack.c.l.b16 %v3351_v28 }
 0x231   : > { %1167 = vrot.lane.b32.xlu1 %v1156_v5, %s2872_s4  ;;  %1163 = vrot.lane.b32.xlu2 %v1156_v5, %s2873_s6  ;;  %v1188_v6 = vunpack.c.l.b16 %v1156_v5  ;;  %v1515_v36 = vpack.c.b16 %v1514_v32, %v1513_v33 }
 0x233   : > { %v1189_v9 = vpack.c.b16 %v1188_v6, %v1187_v7 }
 0x239   : > { %1169 = vrot.lane.b32.xlu2 %v1155_v0, %s2874_s13  ;;  %1190 = vrot.lane.b32.xlu1 %v1189_v9, %s2875_s24 }
 0x241   : > { %1171 = vrot.lane.b32.xlu2 %v1156_v5, %s2874_s13  ;;  %1175 = vrot.lane.b32.xlu1 %v3346_v13, %s2873_s6 }
 0x283   : > { %v1162_v14 = vpop.permute.xlu2 %1161 }
 0x284   : > { %v1213_v16 = vunpack.c.l.b16 %v1162_v14 }
 0x28b   : > { %v1164_v15 = vpop.permute.xlu2 %1163 }
 0x28c   : > { %v1214_v17 = vunpack.c.l.b16 %v1164_v15 }
 0x28e   : > { %v1215_v18 = vpack.c.b16 %v1214_v17, %v1213_v16 }
 0x290   : > { %1216 = vrot.lane.b32.xlu2 %v1215_v18, %s2875_s24 }
 0x293   : > { %v1170_v19 = vpop.permute.xlu2 %1169 }
 0x294   : > { %v1263_v21 = vunpack.c.l.b16 %v1170_v19 }
 0x29b   : > { %v1172_v20 = vpop.permute.xlu2 %1171  ;;  %v1166_v26 = vpop.permute.xlu0 %1165 }
 0x29c   : > { %v1264_v22 = vunpack.c.l.b16 %v1172_v20  ;;  %v1238_v29 = vunpack.c.l.b16 %v1166_v26 }
 0x29e   : > { %v1265_v24 = vpack.c.b16 %v1264_v22, %v1263_v21 }
 0x2a0   : > { %1266 = vrot.lane.b32.xlu2 %v1265_v24, %s2875_s24 }
 0x2a3   : > { %v1168_v27 = vpop.permute.xlu1 %1167 }
 0x2a4   : > { %v1239_v30 = vunpack.c.l.b16 %v1168_v27 }
 0x2a6   : > { %v1240_v31 = vpack.c.b16 %v1239_v30, %v1238_v29 }
 0x2a8   : > { %1241 = vrot.lane.b32.xlu0 %v1240_v31, %s2875_s24 }
 0x2ab   : > { %v1191_v34 = vpop.permute.xlu1 %1190 }
 0x2ac   : > { %v1197_v35 = vsel %vm1192_vm9, %v1191_v34, 0 }
 0x2ad   : > { %1206 = vmatpush.bf16.xpose.msra.mxu2 %v1197_v35 }
 0x2b4   : > { %2269 = vmatmul.msk.bf16.vlgmr.msra.gmra.mxu2 %vm1192_vm9, %v1189_v9 }
 0x2b5   : > { %1527 = vmatpush.bf16.msrb.mxu2 %v1515_v36 }
 0x2ea   : > { %v1217_v37 = vpop.permute.xlu2 %1216 }
 0x2eb   : > { %v1222_v38 = vsel %vm1192_vm9, %v1217_v37, 0  ;;  %v1176_v37 = vpop.permute.xlu1 %1175 }
 0x2ec   : > { %1231 = vmatpush.bf16.xpose.msra.mxu3 %v1222_v38 }
 0x2f3   : > { %2270 = vmatmul.msk.bf16.vlgmr.msra.gmra.mxu3 %vm1192_vm9, %v1215_v18 }
 0x2fa   : > { %v1267_v39 = vpop.permute.xlu2 %1266 }
 0x2fb   : > { %v1272_v40 = vsel %vm1192_vm9, %v1267_v39, 0 }
 0x2fc   : > { %1281 = vmatpush.bf16.xpose.msrb.mxu1 %v1272_v40 }
 0x303   : > { %2272 = vmatmul.msk.bf16.vlgmr.msrb.gmra.mxu1 %vm1192_vm9, %v1265_v24 }
 0x31a   : > { %v1242_v41 = vpop.permute.xlu0 %1241 }
 0x31b   : > { %v1247_v42 = vsel %vm1192_vm9, %v1242_v41, 0 }
 0x31c   : > { %1256 = vmatpush.bf16.xpose.msrb.mxu0 %v1247_v42 }
 0x323   : > { %2271 = vmatmul.msk.bf16.vlgmr.msrb.gmra.mxu0 %vm1192_vm9, %v1240_v31 }
 0x337   : > { %v1208_v47 = vpop.f32.mrf.mxu2 }
 0x338   : > { %v1288_v48 = vmul.f32 0.35355338, %v1208_v47 }
 0x33a   : > { %v3365_v49 = vadd.f32 %v1297_v46, %v1288_v48 }
 0x33c   : > { %v1308_v50 = vsel %vm1307_vm11, %v3365_v49, -inf }
 0x33d   : > { %1309 = vmax.xlane.f32.xlu0 %v1308_v50 }
 0x33f   : > { %v1210_v51 = vpop.f32.mrf.mxu2 }
 0x340   : > { %v1289_v52 = vmul.f32 0.35355338, %v1210_v51 }
 0x342   : > { %v3369_v53 = vadd.f32 %v1297_v46, %v1289_v52 }
 0x344   : > { %v1311_v54 = vsel %vm1307_vm11, %v3369_v53, -inf }
 0x345   : > { %1312 = vmax.xlane.f32.xlu2 %v1311_v54 }
 0x376   : > { %v1233_v55 = vpop.f32.mrf.mxu3 }
 0x377   : > { %v1290_v56 = vmul.f32 0.35355338, %v1233_v55 }
 0x379   : > { %v1301_v57 = vadd.f32 %v1297_v46, %v1290_v56  ;;  %v1539_v56 = vunpack.c.l.b16 %v1176_v37 }
 0x37b   : > { %v1314_v58 = vsel %vm1307_vm11, %v1301_v57, -inf }
 0x37c   : > { %1315 = vmax.xlane.f32.xlu0 %v1314_v58 }
 0x37e   : > { %v1235_v61 = vpop.f32.mrf.mxu3 }
 0x37f   : > { %v1291_v63 = vmul.f32 0.35355338, %v1235_v61 }
 0x380   : > { %v1283_v59 = vpop.f32.mrf.mxu1 }
 0x381   : > { %v1294_v60 = vmul.f32 0.35355338, %v1283_v59  ;;  %v1302_v1 = vadd.f32 %v1297_v46, %v1291_v63 }
 0x383   : > { %v1305_v62 = vadd.f32 %v1297_v46, %v1294_v60  ;;  %v1317_v3 = vsel %vm1307_vm11, %v1302_v1, -inf }
 0x385   : > { %v1326_v0 = vsel %vm1307_vm11, %v1305_v62, -inf }
 0x386   : > { %1327 = vmax.xlane.f32.xlu2 %v1326_v0 }
 0x388   : > { %v1285_v7 = vpop.f32.mrf.mxu1 }
 0x389   : > { %v1295_v9 = vmul.f32 0.35355338, %v1285_v7 }
 0x38b   : > { %v1306_v15 = vadd.f32 %v1297_v46, %v1295_v9 }
 0x38d   : > { %v1329_v17 = vsel %vm1307_vm11, %v1306_v15, -inf }
 0x38e   : > { %1318 = vmax.xlane.f32.xlu2 %v1317_v3 }
 0x3a0   : > { %v1258_v5 = vpop.f32.mrf.mxu0 }
 0x3a1   : > { %v1292_v6 = vmul.f32 0.35355338, %v1258_v5 }
 0x3a3   : > { %v1303_v8 = vadd.f32 %v1297_v46, %v1292_v6 }
 0x3a5   : > { %v1320_v10 = vsel %vm1307_vm11, %v1303_v8, -inf }
 0x3a6   : > { %1321 = vmax.xlane.f32.xlu1 %v1320_v10  ;;  %1179 = vrot.lane.b32.xlu2 %v3346_v13, %s2872_s4 }
 0x3a8   : > { %v1260_v11 = vpop.f32.mrf.mxu0 }
 0x3a9   : > { %v1293_v14 = vmul.f32 0.35355338, %v1260_v11 }
 0x3ab   : > { %v1304_v16 = vadd.f32 %v1297_v46, %v1293_v14 }
 0x3ad   : > { %v1323_v18 = vsel %vm1307_vm11, %v1304_v16, -inf }
 0x3ae   : > { %1330 = vmax.xlane.f32.xlu1 %v1329_v17  ;;  %1324 = vmax.xlane.f32.xlu0 %v1323_v18 }
 0x3b0   : > { %v1310_v19 = vpop.xlane.xlu0 %1309 }
 0x3b1   : > { %v1332_v59 = vsub.f32 %v3365_v49, %v1310_v19 }
 0x3b3   : > { %v1340_v60 = vmul.f32 1.442695, %v1332_v59 }
 0x3b8   : > { %v1313_v22 = vpop.xlane.xlu2 %1312 }
 0x3b9   : > { %v1333_v63 = vsub.f32 %v3369_v53, %v1313_v22 }
 0x3bb   : > { %v1342_v0 = vmul.f32 1.442695, %v1333_v63 }
 0x3c2   : > { %1177 = vrot.lane.b32.xlu0 %v3351_v28, %s2873_s6  ;;  %s3720_s6 = sld [smem:[#allocation25_spill]] }
 0x3c8   : > { %p2312_p12 = scmp.ne.s32.totalorder %s3720_s6, 1 }
 0x3c9   : > { %s3721_s28 = sld [smem:[#allocation55_spill]] (!%p2312_p12) }
 0x3ef   : > { %v1316_v20 = vpop.xlane.xlu0 %1315 }
 0x3f0   : > { %v1334_v21 = vsub.f32 %v1301_v57, %v1316_v20 }
 0x3f2   : > { %v1344_v23 = vmul.f32 1.442695, %v1334_v21 }
 0x3f4   : > { %2507 = vpow2.f32 %v1344_v23 }
 0x3f9   : > { %v1328_v24 = vpop.xlane.xlu2 %1327 }
 0x3fa   : > { %v3383_v25 = vpop.eup %2507  ;;  %v1338_v26 = vsub.f32 %v1305_v62, %v1328_v24 }
 0x3fb   : > { %v1362_v27 = vsel %vm1307_vm11, %v3383_v25, 0.0 }
 0x3fc   : > { %v1352_v29 = vmul.f32 1.442695, %v1338_v26  ;;  %1363 = vadd.xlane.f32.xlu1 %v1362_v27 }
 0x3fe   : > { %2509 = vpow2.f32 %v1352_v29 }
 0x401   : > { %v1319_v30 = vpop.xlane.xlu2 %1318 }
 0x402   : > { %v1335_v31 = vsub.f32 %v1302_v1, %v1319_v30 }
 0x404   : > { %v3387_v32 = vpop.eup %2509  ;;  %v1346_v33 = vmul.f32 1.442695, %v1335_v31 }
 0x405   : > { %v1374_v34 = vsel %vm1307_vm11, %v3387_v32, 0.0 }
 0x406   : > { %2511 = vpow2.f32 %v1346_v33  ;;  %1375 = vadd.xlane.f32.xlu0 %v1374_v34 }
 0x409   : > { %v1180_v26 = vpop.permute.xlu2 %1179 }
 0x40a   : > { %v1565_v34 = vunpack.c.l.b16 %v1180_v26 }
 0x40c   : > { %v3391_v35 = vpop.eup %2511 }
 0x40d   : > { %v1365_v36 = vsel %vm1307_vm11, %v3391_v35, 0.0 }
 0x40e   : > { %1366 = vadd.xlane.f32.xlu0 %v1365_v36 }
 0x419   : > { %v1322_v38 = vpop.xlane.xlu1 %1321 }
 0x41a   : > { %v1336_v39 = vsub.f32 %v1303_v8, %v1322_v38 }
 0x41c   : > { %v1348_v40 = vmul.f32 1.442695, %v1336_v39 }
 0x41e   : > { %2513 = vpow2.f32 %v1348_v40 }
 0x421   : > { %v1325_v41 = vpop.xlane.xlu0 %1324  ;;  %v1331_v42 = vpop.xlane.xlu1 %1330 }
 0x422   : > { %v1337_v43 = vsub.f32 %v1304_v16, %v1325_v41  ;;  %v1339_v44 = vsub.f32 %v1306_v15, %v1331_v42  ;;  %1181 = vrot.lane.b32.xlu0 %v3351_v28, %s2872_s4 }
 0x424   : > { %v3397_v45 = vpop.eup %2513  ;;  %v1350_v46 = vmul.f32 1.442695, %v1337_v43  ;;  %v1354_v47 = vmul.f32 1.442695, %v1339_v44 }
 0x425   : > { %v1368_v48 = vsel %vm1307_vm11, %v3397_v45, 0.0 }
 0x426   : > { %2515 = vpow2.f32 %v1350_v46  ;;  %1369 = vadd.xlane.f32.xlu2 %v1368_v48 }
 0x427   : > { %2517 = vpow2.f32 %v1354_v47 }
 0x428   : > { %2519 = vpow2.f32 %v1340_v60 }
 0x429   : > { %2521 = vpow2.f32 %v1342_v0 }
 0x42c   : > { %v3401_v50 = vpop.eup %2515 }
 0x42d   : > { %v3403_v51 = vpop.eup %2517  ;;  %v1371_v52 = vsel %vm1307_vm11, %v3401_v50, 0.0 }
 0x42e   : > { %1372 = vadd.xlane.f32.xlu1 %v1371_v52  ;;  %v1377_v54 = vsel %vm1307_vm11, %v3403_v51, 0.0  ;;  %v3414_v61 = vpop.eup %2519 }
 0x42f   : > { %1378 = vadd.xlane.f32.xlu2 %v1377_v54  ;;  %v1356_v62 = vsel %vm1307_vm11, %v3414_v61, 0.0  ;;  %v3419_v1 = vpop.eup %2521 }
 0x434   : > { %v1178_v55 = vpop.permute.xlu0 %1177 }
 0x435   : > { %v1540_v57 = vunpack.c.l.b16 %v1178_v55 }
 0x437   : > { %v1541_v58 = vpack.c.b16 %v1540_v57, %v1539_v56 }
 0x439   : > { %1553 = vmatpush.bf16.msrb.mxu3 %v1541_v58 }
 0x447   : > { %1185 = vrot.lane.b32.xlu2 %v3351_v28, %s2874_s13  ;;  %1183 = vrot.lane.b32.xlu1 %v3346_v13, %s2874_s13  ;;  %v1359_v28 = vsel %vm1307_vm11, %v3419_v1, 0.0  ;;  %s3722_s13 = sld [smem:[#allocation56_spill]] (!%p2312_p12) }
 0x44c   : > { %1357 = vadd.xlane.f32.xlu0 %v1356_v62 }
 0x46f   : > { %v1364_v49 = vpop.xlane.xlu1 %1363 }
 0x470   : > { %2523 = vrcp.f32 %v1364_v49  ;;  %v1421_v53 = vand.u32 2147483648, %v1364_v49  ;;  %vm1415_vm13 = vweird.f32 %v1364_v49  ;;  %v1419_v10 = vand.u32 2147483647, %v1364_v49 }
 0x471   : > { %1360 = vadd.xlane.f32.xlu1 %v1359_v28 }
 0x472   : > { %v1422_v16 = vor.u32 1.1754944e-38, %v1421_v53  ;;  %vm1420_vm15 = vcmp.eq.f32.partialorder %v1419_v10, 8.507059e+37 }
 0x476   : > { %v2524_v3 = vpop.eup %2523 }
 0x477   : > { %v1411_v13 = vmul.f32 %v2524_v3, %v1364_v49  ;;  %vm1416_vm12 = vweird.f32 %v2524_v3 }
 0x478   : > { %vm1417_vm14 = vmor %vm1415_vm13, %vm1416_vm12 }
 0x479   : > { %v3423_v5 = vpop.xlane.xlu0 %1375  ;;  %v1412_v6 = vsub.f32 1.0, %v1411_v13 }
 0x47a   : > { %vm1475_vm8 = vweird.f32 %v3423_v5  ;;  %v1479_v0 = vand.u32 2147483647, %v3423_v5 }
 0x47b   : > { %v1413_v7 = vmul.f32 %v2524_v3, %v1412_v6  ;;  %v1481_v6 = vand.u32 2147483648, %v3423_v5 }
 0x47d   : > { %v1414_v9 = vadd.f32 %v2524_v3, %v1413_v7 }
 0x47f   : > { %v1418_v14 = vsel %vm1417_vm14, %v2524_v3, %v1414_v9 }
 0x480   : > { %v1423_v18 = vsel %vm1420_vm15, %v1422_v16, %v1418_v14 }
 0x481   : > { %v1367_v8 = vpop.xlane.xlu0 %1366  ;;  %v1424_v23 = vmul.f32 %v3383_v25, %v1423_v18 }
 0x482   : > { %2525 = vrcp.f32 %v1367_v8  ;;  %v1436_v19 = vand.u32 2147483648, %v1367_v8  ;;  %v1434_v21 = vand.u32 2147483647, %v1367_v8  ;;  %vm1430_vm2 = vweird.f32 %v1367_v8 }
 0x483   : > { %v1502_v31 = vpack.c.bf16 %v1424_v23, %v1424_v23  ;;  %2527 = vrcp.f32 %v3423_v5 }
 0x484   : > { %v1437_v24 = vor.u32 1.1754944e-38, %v1436_v19  ;;  %vm1435_vm4 = vcmp.eq.f32.partialorder %v1434_v21, 8.507059e+37 }
 0x485   : > { %v1536_v39 = vunpack.c.l.b16 %v1502_v31 }
 0x488   : > { %v2526_v11 = vpop.eup %2525 }
 0x489   : > { %v1426_v15 = vmul.f32 %v2526_v11, %v1367_v8  ;;  %vm1431_vm0 = vweird.f32 %v2526_v11  ;;  %v2528_v42 = vpop.eup %2527 }
 0x48a   : > { %vm1432_vm3 = vmor %vm1430_vm2, %vm1431_vm0  ;;  %v1471_v43 = vmul.f32 %v2528_v42, %v3423_v5  ;;  %vm1476_vm10 = vweird.f32 %v2528_v42 }
 0x48b   : > { %v1427_v17 = vsub.f32 1.0, %v1426_v15  ;;  %vm3435_vm14 = vmor %vm1475_vm8, %vm1476_vm10 }
 0x48c   : > { %v1472_v48 = vsub.f32 1.0, %v1471_v43 }
 0x48d   : > { %v1428_v20 = vmul.f32 %v2526_v11, %v1427_v17 }
 0x48e   : > { %v1473_v56 = vmul.f32 %v2528_v42, %v1472_v48 }
 0x48f   : > { %v1429_v22 = vadd.f32 %v2526_v11, %v1428_v20  ;;  %v1482_v20 = vor.u32 1.1754944e-38, %v1481_v6 }
 0x490   : > { %v1474_v3 = vadd.f32 %v2528_v42, %v1473_v56 }
 0x491   : > { %v1433_v27 = vsel %vm1432_vm3, %v2526_v11, %v1429_v22 }
 0x492   : > { %v1438_v29 = vsel %vm1435_vm4, %v1437_v24, %v1433_v27  ;;  %v1478_v17 = vsel %vm3435_vm14, %v2528_v42, %v1474_v3  ;;  %vm1480_vm4 = vcmp.eq.f32.partialorder %v1479_v0, 8.507059e+37 }
 0x493   : > { %v1439_v30 = vmul.f32 %v3391_v35, %v1438_v29  ;;  %v1483_v24 = vsel %vm1480_vm4, %v1482_v20, %v1478_v17 }
 0x494   : > { %v1182_v33 = vpop.permute.xlu0 %1181 }
 0x495   : > { %v1566_v36 = vunpack.c.l.b16 %v1182_v33  ;;  %v1503_v37 = vpack.c.bf16 %v1439_v30, %v1439_v30  ;;  %v1484_v33 = vmul.f32 %v3387_v32, %v1483_v24  ;;  %v2329_v24 = vld [vmem:[%s3712_s11] sm:$0xff] }
 0x497   : > { %v1567_v38 = vpack.c.b16 %v1566_v36, %v1565_v34  ;;  %v1537_v40 = vunpack.c.l.b16 %v1503_v37 }
 0x499   : > { %1579 = vmatpush.bf16.msra.mxu0 %v1567_v38  ;;  %v1370_v25 = vpop.xlane.xlu2 %1369  ;;  %v1538_v41 = vpack.c.b16 %v1537_v40, %v1536_v39  ;;  %v1506_v40 = vpack.c.bf16 %v1484_v33, %v1484_v33 }
 0x49a   : > { %2529 = vrcp.f32 %v1370_v25  ;;  %v1451_v55 = vand.u32 2147483648, %v1370_v25  ;;  %vm1445_vm6 = vweird.f32 %v1370_v25  ;;  %v1449_v58 = vand.u32 2147483647, %v1370_v25 }
 0x49b   : > { %2274 = vmatmul.msk.bf16.vlgmr.msrb.gmra.mxu3 %vm1307_vm11, %v1538_v41 }
 0x49c   : > { %v1452_v49 = vor.u32 1.1754944e-38, %v1451_v55  ;;  %vm1450_vm12 = vcmp.eq.f32.partialorder %v1449_v58, 8.507059e+37 }
 0x4a0   : > { %v2530_v35 = vpop.eup %2529 }
 0x4a1   : > { %v1441_v44 = vmul.f32 %v2530_v35, %v1370_v25  ;;  %v1373_v46 = vpop.xlane.xlu1 %1372  ;;  %vm1446_vm5 = vweird.f32 %v2530_v35 }
 0x4a2   : > { %v1379_v47 = vpop.xlane.xlu2 %1378  ;;  %2531 = vrcp.f32 %v1373_v46  ;;  %vm1447_vm7 = vmor %vm1445_vm6, %vm1446_vm5  ;;  %v1466_v9 = vand.u32 2147483648, %v1373_v46  ;;  %v1464_v11 = vand.u32 2147483647, %v1373_v46  ;;  %vm1460_vm0 = vweird.f32 %v1373_v46 }
 0x4a3   : > { %v1442_v52 = vsub.f32 1.0, %v1441_v44  ;;  %2533 = vrcp.f32 %v1379_v47  ;;  %v1496_v53 = vand.u32 2147483648, %v1379_v47  ;;  %v1494_v16 = vand.u32 2147483647, %v1379_v47 }
 0x4a4   : > { %vm1490_vm2 = vweird.f32 %v1379_v47  ;;  %v1467_v22 = vor.u32 1.1754944e-38, %v1466_v9  ;;  %vm1465_vm6 = vcmp.eq.f32.partialorder %v1464_v11, 8.507059e+37 }
 0x4a5   : > { %v1443_v54 = vmul.f32 %v2530_v35, %v1442_v52  ;;  %v1497_v5 = vor.u32 1.1754944e-38, %v1496_v53 }
 0x4a7   : > { %v1444_v57 = vadd.f32 %v2530_v35, %v1443_v54 }
 0x4a8   : > { %v2532_v59 = vpop.eup %2531 }
 0x4a9   : > { %v2534_v60 = vpop.eup %2533  ;;  %v1448_v62 = vsel %vm1447_vm7, %v2530_v35, %v1444_v57  ;;  %v1456_v63 = vmul.f32 %v2532_v59, %v1373_v46  ;;  %vm1461_vm13 = vweird.f32 %v2532_v59  ;;  %vm1495_vm7 = vcmp.eq.f32.partialorder %v1494_v16, 8.507059e+37 }
 0x4aa   : > { %v1486_v28 = vmul.f32 %v2534_v60, %v1379_v47  ;;  %v1453_v7 = vsel %vm1450_vm12, %v1452_v49, %v1448_v62  ;;  %vm1491_vm15 = vweird.f32 %v2534_v60  ;;  %vm1462_vm3 = vmor %vm1460_vm0, %vm1461_vm13  ;;  %v1186_v39 = vpop.permute.xlu2 %1185  ;;  %v1588_v46 = vunpack.c.l.b16 %v1506_v40 }
 0x4ab   : > { %v1457_v13 = vsub.f32 1.0, %v1456_v63  ;;  %v1454_v18 = vmul.f32 %v3397_v45, %v1453_v7  ;;  %vm1492_vm5 = vmor %vm1490_vm2, %vm1491_vm15  ;;  %v1592_v42 = vunpack.c.l.b16 %v1186_v39 }
 0x4ac   : > { %v1487_v8 = vsub.f32 1.0, %v1486_v28 }
 0x4ad   : > { %v1458_v10 = vmul.f32 %v2532_v59, %v1457_v13  ;;  %v1504_v29 = vpack.c.bf16 %v1454_v18, %v1454_v18 }
 0x4ae   : > { %v1488_v15 = vmul.f32 %v2534_v60, %v1487_v8 }
 0x4af   : > { %v1459_v19 = vadd.f32 %v2532_v59, %v1458_v10  ;;  %v1562_v36 = vunpack.c.l.b16 %v1504_v29 }
 0x4b0   : > { %v1489_v21 = vadd.f32 %v2534_v60, %v1488_v15 }
 0x4b1   : > { %v1463_v23 = vsel %vm1462_vm3, %v2532_v59, %v1459_v19  ;;  %vm1640_vm3 = vcmask 195584  }
 0x4b2   : > { %v1493_v26 = vsel %vm1492_vm5, %v2534_v60, %v1489_v21  ;;  %v1468_v27 = vsel %vm1465_vm6, %v1467_v22, %v1463_v23  ;;  %v2330_v23 = vld [vmem:[%s3711_s14 + $0x8] sm:$0xff] }
 0x4b3   : > { %v1498_v30 = vsel %vm1495_vm7, %v1497_v5, %v1493_v26  ;;  %v1469_v45 = vmul.f32 %v3401_v50, %v1468_v27  ;;  %1673 = vmatpush.bf16.msra.mxu2 %v2330_v23  ;;  %v2498_v23 = vld [vmem:[%s984_s2] ss:$0 sm:$0xff] }
 0x4b4   : > { %v1499_v31 = vmul.f32 %v3403_v51, %v1498_v30 }
 0x4b5   : > { %v1505_v34 = vpack.c.bf16 %v1469_v45, %v1469_v45 }
 0x4b6   : > { %v1507_v37 = vpack.c.bf16 %v1499_v31, %v1499_v31 }
 0x4b7   : > { %v1563_v38 = vunpack.c.l.b16 %v1505_v34  ;;  %1674 = vmatpush.bf16.msra.mxu2 %v2329_v24 }
 0x4b8   : > { %v1589_v35 = vunpack.c.l.b16 %v1507_v37 }
 0x4b9   : > { %v1184_v25 = vpop.permute.xlu1 %1183  ;;  %v1564_v41 = vpack.c.b16 %v1563_v38, %v1562_v36 }
 0x4ba   : > { %v1591_v43 = vunpack.c.l.b16 %v1184_v25  ;;  %v1590_v50 = vpack.c.b16 %v1589_v35, %v1588_v46 }
 0x4bb   : > { %2275 = vmatmul.msk.bf16.vlgmr.msra.gmra.mxu0 %vm1307_vm11, %v1564_v41 }
 0x4bc   : > { %v1593_v44 = vpack.c.b16 %v1592_v42, %v1591_v43 }
 0x4be   : > { %1605 = vmatpush.bf16.msra.mxu1 %v1593_v44  ;;  %v2496_v44 = vld [vmem:[%s981_s30] ss:$0 sm:$0xff]  ;;  %s3714_s30 = scalar_lea.vmem [#allocation12], %s3223_s27  ;;  %s3716_s27 = scalar_lea.vmem [#allocation11], %s3215_s19 }
 0x4bf   : > { %v1358_v32 = vpop.xlane.xlu0 %1357  ;;  %s3715_s29 = smov %s3714_s30 }
 0x4c0   : > { %2535 = vrcp.f32 %v1358_v32  ;;  %v1391_v56 = vand.u32 2147483648, %v1358_v32  ;;  %vm1385_vm10 = vweird.f32 %v1358_v32  ;;  %v1389_v57 = vand.u32 2147483647, %v1358_v32 }
 0x4c1   : > { %2276 = vmatmul.msk.bf16.vlgmr.msra.gmra.mxu1 %vm1307_vm11, %v1590_v50 }
 0x4c2   : > { %v1392_v62 = vor.u32 1.1754944e-38, %v1391_v56  ;;  %vm1390_vm13 = vcmp.eq.f32.partialorder %v1389_v57, 8.507059e+37 }
 0x4c6   : > { %v2536_v51 = vpop.eup %2535 }
 0x4c7   : > { %v1381_v47 = vmul.f32 %v2536_v51, %v1358_v32  ;;  %vm1386_vm8 = vweird.f32 %v2536_v51 }
 0x4c8   : > { %vm1387_vm12 = vmor %vm1385_vm10, %vm1386_vm8  ;;  %vm1832_vm8 = vcmask 523264  }
 0x4c9   : > { %v1382_v48 = vsub.f32 1.0, %v1381_v47 }
 0x4cb   : > { %v1383_v52 = vmul.f32 %v2536_v51, %v1382_v48 }
 0x4cd   : > { %v1384_v55 = vadd.f32 %v2536_v51, %v1383_v52 }
 0x4cf   : > { %v1388_v59 = vsel %vm1387_vm12, %v2536_v51, %v1384_v55 }
 0x4d0   : > { %v1393_v0 = vsel %vm1390_vm13, %v1392_v62, %v1388_v59 }
 0x4d1   : > { %v1394_v6 = vmul.f32 %v3414_v61, %v1393_v0 }
 0x4d3   : > { %v1500_v10 = vpack.c.bf16 %v1394_v6, %v1394_v6 }
 0x4d5   : > { %v1510_v14 = vunpack.c.l.b16 %v1500_v10 }
 0x4e4   : > { %v1361_v54 = vpop.xlane.xlu1 %1360 }
 0x4e5   : > { %2537 = vrcp.f32 %v1361_v54  ;;  %v1406_v49 = vand.u32 2147483648, %v1361_v54  ;;  %v1404_v3 = vand.u32 2147483647, %v1361_v54  ;;  %vm1400_vm15 = vweird.f32 %v1361_v54 }
 0x4e7   : > { %v1407_v7 = vor.u32 1.1754944e-38, %v1406_v49  ;;  %vm1405_vm2 = vcmp.eq.f32.partialorder %v1404_v3, 8.507059e+37  ;;  %v2332_v49 = vld [vmem:[%s3714_s30 + $0x8] sm:$0xff] }
 0x4e8   : > { %1769 = vmatpush.bf16.msra.mxu3 %v2332_v49 }
 0x4eb   : > { %v2538_v58 = vpop.eup %2537 }
 0x4ec   : > { %v1396_v60 = vmul.f32 %v2538_v58, %v1361_v54  ;;  %vm1401_vm14 = vweird.f32 %v2538_v58 }
 0x4ed   : > { %vm1402_vm0 = vmor %vm1400_vm15, %vm1401_vm14 }
 0x4ee   : > { %v1397_v63 = vsub.f32 1.0, %v1396_v60 }
 0x4f0   : > { %v1398_v28 = vmul.f32 %v2538_v58, %v1397_v63 }
 0x4f2   : > { %v1399_v13 = vadd.f32 %v2538_v58, %v1398_v28 }
 0x4f4   : > { %v1403_v8 = vsel %vm1402_vm0, %v2538_v58, %v1399_v13  ;;  %v2331_v13 = vld [vmem:[%s3715_s29] sm:$0xff] }
 0x4f5   : > { %v1408_v9 = vsel %vm1405_vm2, %v1407_v7, %v1403_v8  ;;  %1770 = vmatpush.bf16.msra.mxu3 %v2331_v13 }
 0x4f6   : > { %v1409_v53 = vmul.f32 %v3419_v1, %v1408_v9 }
 0x4f8   : > { %v1501_v11 = vpack.c.bf16 %v1409_v53, %v1409_v53 }
 0x4fa   : > { %v1511_v15 = vunpack.c.l.b16 %v1501_v11 }
 0x4fc   : > { %v1512_v16 = vpack.c.b16 %v1511_v15, %v1510_v14 }
 0x4fe   : > { %2273 = vmatmul.msk.bf16.vlgmr.msrb.gmra.mxu2 %vm1307_vm11, %v1512_v16 }
 0x51e   : > { %v1555_v18 = vpop.f32.mrf.mxu3 }
 0x526   : > { %v1557_v21 = vpop.f32.mrf.mxu3 }
 0x527   : > { %v2482_v22 = vpack.i.bf16 %v1557_v21, %v1555_v18  ;;  %v2497_v21 = vld [vmem:[%s3716_s27] ss:$0 sm:$0xff] }
 0x538   : > { %v1581_v17 = vpop.f32.mrf.mxu0 }
 0x53e   : > { %v1607_v20 = vpop.f32.mrf.mxu1 }
 0x540   : > { %v1583_v19 = vpop.f32.mrf.mxu0 }
 0x541   : > { %v2477_v61 = vpack.i.bf16 %v1583_v19, %v1581_v17 }
 0x543   : > { %2478 = vrot.lane.b32.xlu2 %v2477_v61, %s2877_s16 }
 0x546   : > { %v1609_v1 = vpop.f32.mrf.mxu1 }
 0x547   : > { %v2487_v5 = vpack.i.bf16 %v1609_v1, %v1607_v20 }
 0x54b   : > { %2483 = vrot.lane.b32.xlu2 %v2482_v22, %s2878_s1 }
 0x553   : > { %2488 = vrot.lane.b32.xlu2 %v2487_v5, %s2879_s3 }
 0x581   : > { %v1529_v27 = vpop.f32.mrf.mxu2 }
 0x589   : > { %v1531_v31 = vpop.f32.mrf.mxu2 }
 0x59d   : > { %v2479_v26 = vpop.permute.xlu2 %2478 }
 0x59e   : > { %v2481_v36 = vunpack.i.h.bf16 %v2479_v26  ;;  %v2480_v37 = vunpack.i.l.bf16 %v2479_v26 }
 0x5a5   : > { %v2484_v29 = vpop.permute.xlu2 %2483 }
 0x5a6   : > { %v2486_v30 = vunpack.i.h.bf16 %v2484_v29  ;;  %v2485_v45 = vunpack.i.l.bf16 %v2484_v29 }
 0x5a8   : > { %v1636_v33 = vsel %vm1192_vm9, %v1529_v27, %v2485_v45  ;;  %v1637_v34 = vsel %vm1192_vm9, %v1531_v31, %v2486_v30  ;;  %v2336_v31 = vld [vmem:[%s3291_s10 + $0x18] sm:$0xff] }
 0x5a9   : > { %v1638_v25 = vsel %vm1307_vm11, %v1636_v33, %v2480_v37  ;;  %v1639_v41 = vsel %vm1307_vm11, %v1637_v34, %v2481_v36  ;;  %1840 = vmatpush.bf16.msrb.mxu0 %v2336_v31  ;;  %v2335_v33 = vld [vmem:[%s3291_s10 + $0x10] sm:$0xff]  ;;  %v2334_v34 = vld [vmem:[%s3291_s10 + $0x8] sm:$0xff]  ;;  %v2499_v36 = vld [vmem:[%s987_s0] ss:$0 sm:$0xff] }
 0x5aa   : > { %v2333_v37 = vld [vmem:[%s3291_s10] sm:$0xff] }
 0x5ad   : > { %v2489_v38 = vpop.permute.xlu2 %2488  ;;  %1841 = vmatpush.bf16.msrb.mxu0 %v2335_v33 }
 0x5ae   : > { %v2491_v39 = vunpack.i.h.bf16 %v2489_v38  ;;  %v2490_v40 = vunpack.i.l.bf16 %v2489_v38 }
 0x5b0   : > { %v1641_v42 = vsel %vm1640_vm3, %v1638_v25, %v2490_v40  ;;  %v1642_v43 = vsel %vm1640_vm3, %v1639_v41, %v2491_v39 }
 0x5b1   : > { %v1643_v35 = vpack.c.bf16 %v1642_v43, %v1641_v42  ;;  %1842 = vmatpush.bf16.msrb.mxu0 %v2334_v34 }
 0x5b3   : > { %2285 = vmatmul.msk.bf16.vlgmr.msra.gmra.mxu2 %vm1015_vm1, %v1643_v35 }
 0x5b5   : > { %1843 = vmatpush.bf16.msrb.mxu0 %v2333_v37 }
 0x636   : > { %v1676_v46 = vpop.f32.mrf.mxu2 }
 0x637   : > { %v1677_v50 = vadd.f32 %v2496_v44, %v1676_v46 }
 0x639   : > { %v3466_v32 = vadd.f32 %v1677_v50, %v3296_v2 }
 0x63b   : > { %v1685_v51 = vsel %vm1015_vm1, %v3466_v32, 0.0 }
 0x63c   : > { %1686 = vadd.xlane.f32.xlu2 %v1685_v51 }
 0x63e   : > { %v1678_v47 = vpop.f32.mrf.mxu2 }
 0x63f   : > { %v1679_v48 = vadd.f32 %v2496_v44, %v1678_v47 }
 0x641   : > { %v3471_v52 = vadd.f32 %v1679_v48, %v3300_v4 }
 0x643   : > { %v1688_v54 = vsel %vm1015_vm1, %v3471_v52, 0.0 }
 0x644   : > { %1689 = vadd.xlane.f32.xlu0 %v1688_v54 }
 0x6af   : > { %v1687_v55 = vpop.xlane.xlu2 %1686 }
 0x6b0   : > { %v1691_v56 = vmul.f32 %v1687_v55, %v3304_v12 }
 0x6b2   : > { %v1693_v2 = vsub.f32 %v3466_v32, %v1691_v56 }
 0x6b4   : > { %v1695_v57 = vmul.f32 %v1693_v2, %v1693_v2 }
 0x6b6   : > { %v1697_v58 = vsel %vm1015_vm1, %v1695_v57, 0.0 }
 0x6b7   : > { %v1690_v59 = vpop.xlane.xlu0 %1689  ;;  %1698 = vadd.xlane.f32.xlu1 %v1697_v58 }
 0x6b8   : > { %v1692_v60 = vmul.f32 %v1690_v59, %v3304_v12 }
 0x6ba   : > { %v1694_v4 = vsub.f32 %v3471_v52, %v1692_v60 }
 0x6bc   : > { %v1696_v62 = vmul.f32 %v1694_v4, %v1694_v4 }
 0x6be   : > { %v1700_v63 = vsel %vm1015_vm1, %v1696_v62, 0.0  ;;  %v2500_v62 = vld [vmem:[%s995_s23] ss:$0 sm:$0xff] }
 0x6bf   : > { %1701 = vadd.xlane.f32.xlu0 %v1700_v63 }
 0x72a   : > { %v1699_v0 = vpop.xlane.xlu1 %1698 }
 0x72b   : > { %v1703_v28 = vmul.f32 %v1699_v0, %v3304_v12 }
 0x72d   : > { %v1705_v3 = vadd.f32 1e-05, %v1703_v28 }
 0x72f   : > { %2539 = vrsqrt.f32 %v1705_v3  ;;  %vm1713_vm11 = vweird.f32 %v1705_v3 }
 0x732   : > { %v1702_v6 = vpop.xlane.xlu0 %1701 }
 0x733   : > { %v1704_v7 = vmul.f32 %v1702_v6, %v3304_v12 }
 0x735   : > { %v2540_v8 = vpop.eup %2539  ;;  %v1706_v9 = vadd.f32 1e-05, %v1704_v7 }
 0x736   : > { %v1708_v53 = vmul.f32 %v2540_v8, %v1705_v3  ;;  %vm1714_vm9 = vweird.f32 %v2540_v8 }
 0x737   : > { %2541 = vrsqrt.f32 %v1706_v9  ;;  %vm1715_vm4 = vmor %vm1713_vm11, %vm1714_vm9  ;;  %vm1723_vm6 = vweird.f32 %v1706_v9 }
 0x738   : > { %v1709_v10 = vmul.f32 %v2540_v8, %v1708_v53 }
 0x73a   : > { %v1710_v11 = vmul.f32 0.5, %v1709_v10 }
 0x73c   : > { %v1711_v14 = vsub.f32 1.5, %v1710_v11 }
 0x73d   : > { %v2542_v15 = vpop.eup %2541 }
 0x73e   : > { %v1712_v16 = vmul.f32 %v2540_v8, %v1711_v14  ;;  %v1718_v17 = vmul.f32 %v2542_v15, %v1706_v9  ;;  %vm1724_vm5 = vweird.f32 %v2542_v15 }
 0x73f   : > { %vm1725_vm7 = vmor %vm1723_vm6, %vm1724_vm5 }
 0x740   : > { %v1719_v18 = vmul.f32 %v2542_v15, %v1718_v17  ;;  %v1716_v19 = vsel %vm1715_vm4, %v2540_v8, %v1712_v16 }
 0x741   : > { %v1727_v22 = vmul.f32 %v1716_v19, %v1693_v2 }
 0x742   : > { %v1720_v61 = vmul.f32 0.5, %v1719_v18 }
 0x743   : > { %v1732_v24 = vmul.f32 %v2497_v21, %v1727_v22 }
 0x744   : > { %v1721_v20 = vsub.f32 1.5, %v1720_v61 }
 0x745   : > { %v1737_v29 = vadd.f32 %v2498_v23, %v1732_v24 }
 0x746   : > { %v1722_v1 = vmul.f32 %v2542_v15, %v1721_v20 }
 0x748   : > { %v1726_v5 = vsel %vm1725_vm7, %v2542_v15, %v1722_v1 }
 0x749   : > { %v1728_v26 = vmul.f32 %v1726_v5, %v1694_v4 }
 0x74b   : > { %v1733_v27 = vmul.f32 %v2497_v21, %v1728_v26 }
 0x74d   : > { %v1738_v30 = vadd.f32 %v2498_v23, %v1733_v27 }
 0x74f   : > { %v1739_v45 = vpack.c.bf16 %v1738_v30, %v1737_v29 }
 0x751   : > { %2294 = vmatmul.msk.bf16.vlgmr.msra.gmra.mxu3 %vm1015_vm1, %v1739_v45 }
 0x7d4   : > { %v1772_v38 = vpop.f32.mrf.mxu3 }
 0x7d5   : > { %v1773_v39 = vadd.f32 %v2499_v36, %v1772_v38 }
 0x7d7   : > { %v1779_v40 = vmul.f32 0.044715, %v1773_v39  ;;  %v1777_v2 = vmul.f32 0.5, %v1773_v39 }
 0x7d9   : > { %v1781_v25 = vmul.f32 %v1779_v40, %v1773_v39 }
 0x7db   : > { %v1783_v41 = vmul.f32 %v1781_v25, %v1773_v39 }
 0x7dc   : > { %v1774_v42 = vpop.f32.mrf.mxu3 }
 0x7dd   : > { %v1785_v43 = vadd.f32 %v1783_v41, %v1773_v39  ;;  %v1775_v35 = vadd.f32 %v2499_v36, %v1774_v42 }
 0x7df   : > { %v1780_v44 = vmul.f32 0.044715, %v1775_v35  ;;  %v1787_v46 = vmul.f32 0.7978846, %v1785_v43  ;;  %v1778_v57 = vmul.f32 0.5, %v1775_v35 }
 0x7e1   : > { %v1782_v50 = vmul.f32 %v1780_v44, %v1775_v35  ;;  %2543 = vtanh.f32 %v1787_v46 }
 0x7e3   : > { %v1784_v51 = vmul.f32 %v1782_v50, %v1775_v35 }
 0x7e5   : > { %v1786_v47 = vadd.f32 %v1784_v51, %v1775_v35 }
 0x7e7   : > { %v1788_v48 = vmul.f32 0.7978846, %v1786_v47  ;;  %v2544_v54 = vpop.eup %2543 }
 0x7e8   : > { %v1791_v55 = vadd.f32 1.0, %v2544_v54 }
 0x7e9   : > { %2545 = vtanh.f32 %v1788_v48 }
 0x7ea   : > { %v1793_v59 = vmul.f32 %v1791_v55, %v1777_v2 }
 0x7ef   : > { %v2546_v56 = vpop.eup %2545 }
 0x7f0   : > { %v1792_v58 = vadd.f32 1.0, %v2546_v56 }
 0x7f2   : > { %v1794_v60 = vmul.f32 %v1792_v58, %v1778_v57 }
 0x7f4   : > { %v1795_v4 = vpack.c.bf16 %v1794_v60, %v1793_v59 }
 0x7f6   : > { %2311 = vmatmul.msk.bf16.vlgmr.msrb.gmra.mxu0 %vm1832_vm8, %v1795_v4 }
 0x873   : > { %v1845_v63 = vpop.f32.mrf.mxu0 }
 0x874   : > { %v1846_v0 = vadd.f32 %v2500_v62, %v1845_v63 }
 0x876   : > { %v1850_v49 = vadd.f32 %v1846_v0, %v3466_v32 }
 0x878   : > { %1852 = vst.msk [vmem:[#allocation2] sm:$0xff] %vm1015_vm1, %v1850_v49 }
 0x87b   : > { %v1847_v28 = vpop.f32.mrf.mxu0 }
 0x87c   : > { %v1848_v3 = vadd.f32 %v2500_v62, %v1847_v28  ;;  %1857 = sbr.rel (%p2312_p12) target bundleno = 2454 (0x996), region = 128 }
 0x87e   : > { %v1851_v13 = vadd.f32 %v1848_v3, %v3471_v52 }
 0x880   : > { %1853 = vst.msk [vmem:[#allocation2 + $0x8] sm:$0xff] %vm1015_vm1, %v1851_v13 }
 0x881   : > { %v1860_v6 = vsel %vm1015_vm1, %v1850_v49, 0.0  ;;  %v1863_v7 = vsel %vm1015_vm1, %v1851_v13, 0.0  ;;  %v2547_v30 = vld [vmem:[%s3721_s28] ss:$0 sm:$0xff] }
 0x882   : > { %1861 = vadd.xlane.f32.xlu0 %v1860_v6  ;;  %v2548_v33 = vld [vmem:[%s3722_s13] ss:$0 sm:$0xff] }
 0x88a   : > { %1864 = vadd.xlane.f32.xlu0 %v1863_v7 }
 0x8f5   : > { %v1862_v8 = vpop.xlane.xlu0 %1861 }
 0x8f6   : > { %v1866_v32 = vmul.f32 %v1862_v8, %v3304_v12 }
 0x8f8   : > { %v1868_v9 = vsub.f32 %v1850_v49, %v1866_v32 }
 0x8fa   : > { %v1870_v53 = vmul.f32 %v1868_v9, %v1868_v9 }
 0x8fc   : > { %v1872_v10 = vsel %vm1015_vm1, %v1870_v53, 0.0 }
 0x8fd   : > { %1873 = vadd.xlane.f32.xlu1 %v1872_v10  ;;  %v1865_v52 = vpop.xlane.xlu0 %1864 }
 0x8fe   : > { %v1867_v11 = vmul.f32 %v1865_v52, %v3304_v12 }
 0x900   : > { %v1869_v14 = vsub.f32 %v1851_v13, %v1867_v11 }
 0x902   : > { %v1871_v15 = vmul.f32 %v1869_v14, %v1869_v14 }
 0x904   : > { %v1875_v16 = vsel %vm1015_vm1, %v1871_v15, 0.0 }
 0x905   : > { %1876 = vadd.xlane.f32.xlu1 %v1875_v16 }
 0x970   : > { %v1874_v17 = vpop.xlane.xlu1 %1873 }
 0x971   : > { %v1878_v18 = vmul.f32 %v1874_v17, %v3304_v12 }
 0x973   : > { %v1880_v19 = vadd.f32 1e-05, %v1878_v18 }
 0x975   : > { %2549 = vrsqrt.f32 %v1880_v19  ;;  %vm1888_vm12 = vweird.f32 %v1880_v19 }
 0x978   : > { %v1877_v61 = vpop.xlane.xlu1 %1876 }
 0x979   : > { %v1879_v20 = vmul.f32 %v1877_v61, %v3304_v12 }
 0x97b   : > { %v2550_v21 = vpop.eup %2549  ;;  %v1881_v22 = vadd.f32 1e-05, %v1879_v20 }
 0x97c   : > { %v1883_v1 = vmul.f32 %v2550_v21, %v1880_v19  ;;  %vm1889_vm10 = vweird.f32 %v2550_v21 }
 0x97d   : > { %2551 = vrsqrt.f32 %v1881_v22  ;;  %vm1890_vm13 = vmor %vm1888_vm12, %vm1889_vm10  ;;  %vm1898_vm15 = vweird.f32 %v1881_v22 }
 0x97e   : > { %v1884_v5 = vmul.f32 %v2550_v21, %v1883_v1 }
 0x980   : > { %v1885_v23 = vmul.f32 0.5, %v1884_v5 }
 0x982   : > { %v1886_v24 = vsub.f32 1.5, %v1885_v23 }
 0x983   : > { %v2552_v26 = vpop.eup %2551 }
 0x984   : > { %v1887_v27 = vmul.f32 %v2550_v21, %v1886_v24  ;;  %v1893_v29 = vmul.f32 %v2552_v26, %v1881_v22  ;;  %vm1899_vm14 = vweird.f32 %v2552_v26 }
 0x985   : > { %vm1900_vm0 = vmor %vm1898_vm15, %vm1899_vm14 }
 0x986   : > { %v1891_v45 = vsel %vm1890_vm13, %v2550_v21, %v1887_v27  ;;  %v1894_v12 = vmul.f32 %v2552_v26, %v1893_v29 }
 0x987   : > { %v1902_v31 = vmul.f32 %v1891_v45, %v1868_v9 }
 0x988   : > { %v1895_v34 = vmul.f32 0.5, %v1894_v12 }
 0x989   : > { %v1907_v36 = vmul.f32 %v2547_v30, %v1902_v31 }
 0x98a   : > { %v1896_v37 = vsub.f32 1.5, %v1895_v34 }
 0x98b   : > { %v1912_v38 = vadd.f32 %v2548_v33, %v1907_v36 }
 0x98c   : > { %v1897_v39 = vmul.f32 %v2552_v26, %v1896_v37 }
 0x98d   : > { %1914 = vst.msk [vmem:[%s3293_s8] sm:$0xff] %vm1015_vm1, %v1912_v38 }
 0x98e   : > { %v1901_v40 = vsel %vm1900_vm0, %v2552_v26, %v1897_v39 }
 0x98f   : > { %v1903_v25 = vmul.f32 %v1901_v40, %v1869_v14 }
 0x991   : > { %v1908_v41 = vmul.f32 %v2547_v30, %v1903_v25 }
 0x993   : > { %v1913_v42 = vadd.f32 %v2548_v33, %v1908_v41 }
 0x995   : > { %1915 = vst.msk [vmem:[%s3293_s8 + $0x8] sm:$0xff] %vm1015_vm1, %v1913_v42 }
 0x996 PF: > { %s3723_s24 = sld [smem:[#allocation26_spill]]  ;;  %s1929_s25 = sshll.u32 %s3293_s8, 4  ;;  %s1930_s25 = int_to_ptr.vmem [resolvable:$true] %s1929_s25 }
 0x997   : > { %s3725_s11 = sld [smem:[#allocation57_spill]]  ;;  %s1917_s30 = scalar_lea.sflag [#allocation5], %s3205_s15 }
 0x99c   : > { %s2337_s16 = sshll.u32 %s3723_s24, 4 }
 0x99d   : > { %s1928_s9 = scalar_lea.hbm %s3725_s11, %s2337_s16  ;;  %s2753_s5 = scalar_lea.hbm %s3725_s11, 32 }
 0x99e   : > { %s1931_s7 = sshll.u32 %s1928_s9, 4  ;;  %s1932_s7 = int_to_ptr.hbm [resolvable:$true] %s1931_s7 }
 0x99f   : > { %s2747_s29 = sshra.s32 %s1932_s7, 4  ;;  %s2748_s29 = int_to_ptr.hbm [resolvable:$true] %s2747_s29 }
 0x9a0   : > { %s2749_s27 = scalar_lea.hbm %s2748_s29, 16  ;;  %p2754_p1 = scmp.lt.s32.totalorder %s2748_s29, %s3725_s11 }
 0x9a1   : > { %p2750_p2 = scmp.ne.s32.totalorder %s2748_s29, %s2749_s27  ;;  %p2755_p8 = scmp.lt.s32.totalorder %s2753_s5, %s2749_s27 }
 0x9a3   : > { %p2751_p4 = pnand %p2750_p2, %p3149_p0  ;;  %p2756_p9 = por %p2755_p8, %p2754_p1 }
 0x9a5   : > { %p2752_p6 = pneg %p2751_p4 }
 0x9a7   : > { %p2757_p13 = pnand %p2756_p9, %p2752_p6 }
 0x9a9   : > { %2760 = shalt.err (!%p2757_p13)
}
 0x9aa   : > { %s2880_s15 = smov 128  }
 0x9ab   : > { %2350 = dma.vmem_to_hbm [thread:$0]  (%p3149_p0), %s1930_s25, 256, %s1932_s7, %s1917_s30, %s2880_s15, %s2880_s15, %s2878_s1  }
 0x9ac PF: > { %s3726_s8 = sld [smem:[#allocation29_spill]] }
 0x9ad   : > { %s3727_s4 = sld [smem:[#allocation22_spill]] }
 0x9b2   : > { %p2376_p11 = scmp.ge.s32.totalorder %s3726_s8, 2 }
 0x9b3   : > { %s1946_s0 = sand.u32 1, %s3727_s4  }
 0x9b4   : > { %p2372_p5 = pnand %p2376_p11, %p3164_p3  ;;  %s1947_s10 = scalar_lea.sflag [#allocation5], %s1946_s0 }
 0x9b6   : > { %p2373_p7 = pneg %p2372_p5 }
 0x9b8   : > { %2822 = dma.done.wait (%p2373_p7), %s1947_s10, 256  }
 0x9b9   : > { %2824 = vsyncadd (%p2373_p7), %s1947_s10, 4294967040  ;;  %s44_s3 = sadd.s32 1, %s3726_s8   ;;  %s3729_s0 = sld [smem:[#allocation20_spill]] }
 0x9ba   : > { %p41_p10 = scmp.ge.s32.totalorder %s44_s3, 6   ;;  %s3730_s30 = sld [smem:[#allocation21_spill]] }
 0x9bb   : > { %s3731_s20 = sld [smem:[#allocation31_spill]] }
 0x9bc   : > { %s3732_s21 = sld [smem:[#allocation23_spill]] }
 0x9bd   : > { %s3733_s1 = sld [smem:[#allocation24_spill]] }
 0x9be   : > { %s3734_s22 = sld [smem:[#allocation36_spill]]  ;;  %43 = sbr.rel (!%p41_p10) target bundleno = 36 (0x24), region = 243 }
 0x9bf   : > { %s3735_s2 = sld [smem:[#allocation27_spill]] }
 0x9c0   : > { %s3736_s23 = sld [smem:[#allocation28_spill]] }
 0x9c1   : > { %s3737_s24 = sld [smem:[#allocation30_spill]] }
 0x9c2   : > { %s3738_s25 = sld [smem:[#allocation33_spill]] }
 0x9c3   :  { %1953 = vsyncpa [#allocation4], 1 }
 0x9c4   :  { %1955 = vsyncpa [#allocation4 + $0x1], 1 }
 0x9c5   :  { %1956 = vsyncpa [#allocation7], 1 }
 0x9c6   :  { %1958 = vsyncpa [#allocation7 + $0x1], 1 }
 0x9c7   :  { %1959 = vsyncpa [#allocation10], 1 }
 0x9c8   :  { %1961 = vsyncpa [#allocation10 + $0x1], 1 }
 0x9c9   :  { %1962 = vsyncpa [#allocation13], 1 }
 0x9ca   :  { %1964 = vsyncpa [#allocation13 + $0x1], 1 }
 0x9cb   :  { %1965 = vsyncpa [#allocation5], 1 }
 0x9cc   :  { %1967 = vsyncpa [#allocation5 + $0x1], 1 }

</bundles_post_ra>
